<compile_context>
chip_gen: v5e
topology: v5e:2x2
jax: 0.10.0
libtpu: 0.0.40
codegen_flags: <defaults>
</compile_context>

<pallas_src>
import numpy as np
import jax
import jax.numpy as jnp
from jax.experimental import pallas as pl
from jax.experimental.pallas import tpu as pltpu

N_BATCH = 2
C_IN, L_IN = 12, 126
K1, C1 = 15, 3          # conv1: 12 -> 3, kernel 15
K2, C2 = 15, 6          # conv2: 3 -> 6, kernel 15
L1 = L_IN - K1 + 1      # 112
P1 = L1 // 2            # 56
L2 = P1 - K2 + 1        # 42
P2 = L2 // 2            # 21
N_OUT = 6

U = L1 // 4                         # 28  pE / pO rows per sample
PE_LEN = N_BATCH * U                # 56  rows of pE (== rows of pO)
A_ROWS = (N_BATCH - 1) * U + P2     # 49  rows covering all samples' outputs (+gap)
TAP_ROWS = PE_LEN + A_ROWS          # 105 rows per conv2 tap slice
N_PAIR = K2 // 2 + 1                # 8   even/odd tap pairs (last odd is zero)


def net_kernel(x1_ref, w1_ref, b1_ref, w2p_ref, b2_ref,
               w3_ref, mask_ref, g_ref, sel_ref, b3_ref, out_ref):
    # ---- conv1 + bias + ReLU: one im2col matmul for the whole batch ----
    # x1 rows are ordered [phase0 | phase2 | phase1 | phase3]; phase p holds
    # the windows of conv1 output positions l = 4u + p, rows (n, u), n outer.
    a1 = jnp.dot(x1_ref[...], w1_ref[...], preferred_element_type=jnp.float32)
    a1 = jnp.maximum(a1 + b1_ref[...], 0.0)                     # (224, 3)

    # ---- maxpool1, stride-free: max of the two halves gives [pE ; pO] with
    #      pE[n*28+u] = p1[n, 2u]  and  pO[n*28+u] = p1[n, 2u+1].
    peo = jnp.maximum(a1[:2 * PE_LEN], a1[2 * PE_LEN:])         # (112, 3)

    # ---- conv2: 8 paired-tap matmuls; every 105-row overlapping slice of
    #      [pE;pO] feeds both samples and both pooling parities in one dot.
    #      w2p[j] = [w2[2j] | w2[2j+1]] (3,12); odd block is zero for j=7.
    acc = None
    for j in range(N_PAIR):                                     # j = 0..7
        s = peo[j:j + TAP_ROWS]                                 # (105, 3)
        d = jnp.dot(s, w2p_ref[j], preferred_element_type=jnp.float32)  # (105,12)
        acc = d if acc is None else acc + d
    acc_e = acc[:, :C2]       # sum_j peo[r+j] @ w2[2j]
    acc_o = acc[:, C2:]       # sum_j peo[r+j] @ w2[2j+1]

    # Recombine the two accumulators: rows r = n*28 + t, t = 0..20 valid,
    # rows 21..27 are cross-sample junk (zeroed later by the selector/mask).
    conv_even = acc_e[0:A_ROWS] + acc_o[PE_LEN:TAP_ROWS]        # c2[n, 2t]
    conv_odd = acc_e[PE_LEN:TAP_ROWS] + acc_o[1:1 + A_ROWS]     # c2[n, 2t+1]
    a2e = jnp.maximum(conv_even + b2_ref[...], 0.0)
    a2o = jnp.maximum(conv_odd + b2_ref[...], 0.0)
    p2 = jnp.maximum(a2e, a2o)                                  # (49, 6)

    # ---- fc3: channel contraction on the MXU, then block-diagonal pick and
    #      per-sample fold via precomputed 0/1 matrices (3 dots total).
    z = jnp.dot(p2, w3_ref[...], preferred_element_type=jnp.float32)          # (49,126)
    h = jnp.dot(z * mask_ref[...], g_ref[...],
                preferred_element_type=jnp.float32)                           # (49, 6)
    out_ref[...] = (jnp.dot(sel_ref[...], h, preferred_element_type=jnp.float32)
                    + b3_ref[...])                                            # (2, 6)


@jax.jit
def net_forward(x_ncl, conv1_w, conv1_b, conv2_w, conv2_b, fc3_w, fc3_b):
    """x_ncl: (N, 12, 126) float32, PyTorch NCW layout. Returns (N, 6)."""
    x_nlc = jnp.transpose(x_ncl, (0, 2, 1))                     # (N, 126, 12)

    # conv1 im2col, built once in the wrapper. Feature order = k*C_IN + ci.
    win = jnp.stack([x_nlc[:, k:k + L1, :] for k in range(K1)], axis=2)
    winf = win.reshape(N_BATCH, L1, K1 * C_IN)                  # (N, 112, 180)
    # Split conv1 positions l = 4u + p into phase blocks and order them
    # [0, 2, 1, 3]: the in-kernel max of the two halves then yields [pE ; pO].
    winp = jnp.transpose(winf.reshape(N_BATCH, U, 4, K1 * C_IN), (2, 0, 1, 3))
    x1 = jnp.concatenate([winp[0], winp[2], winp[1], winp[3]],
                         axis=0).reshape(4 * N_BATCH * U, K1 * C_IN)   # (224, 180)

    w1 = jnp.transpose(conv1_w, (2, 1, 0)).reshape(K1 * C_IN, C1)      # (180, 3)
    w2 = jnp.transpose(conv2_w, (2, 1, 0))                             # (15, 3, 6)
    # Pair even/odd conv2 taps column-wise; pad the missing odd tap with 0.
    w2e = w2[0::2]                                                     # (8, 3, 6)
    w2o = jnp.concatenate([w2[1::2], jnp.zeros((1, C1, C2), w2.dtype)],
                          axis=0)                                      # (8, 3, 6)
    w2p = jnp.concatenate([w2e, w2o], axis=-1)                         # (8, 3, 12)
    # fc3 weight rearranged to rows = input channel c, cols = t*N_OUT + j.
    w3 = jnp.transpose(fc3_w.reshape(N_OUT, C2, P2),
                       (1, 2, 0)).reshape(C2, P2 * N_OUT)              # (6, 126)
    b1 = conv1_b.reshape(1, C1)
    b2 = conv2_b.reshape(1, C2)
    b3 = fc3_b.reshape(1, N_OUT)

    # Constant selector / mask matrices (become compile-time constants).
    tvals = np.full((A_ROWS,), -1, np.int64)
    sel_np = np.zeros((N_BATCH, A_ROWS), np.float32)
    for n in range(N_BATCH):
        tvals[n * U:n * U + P2] = np.arange(P2)
        sel_np[n, n * U:n * U + P2] = 1.0
    col_t = np.arange(P2 * N_OUT) // N_OUT
    mask_np = (tvals[:, None] == col_t[None, :]).astype(np.float32)    # (49, 126)
    g_np = (np.arange(P2 * N_OUT)[:, None] % N_OUT
            == np.arange(N_OUT)[None, :]).astype(np.float32)           # (126, 6)

    return pl.pallas_call(
        net_kernel,
        out_shape=jax.ShapeDtypeStruct((N_BATCH, N_OUT), jnp.float32),
        in_specs=[pl.BlockSpec(memory_space=pltpu.MemorySpace.VMEM)] * 10,
        out_specs=pl.BlockSpec(memory_space=pltpu.MemorySpace.VMEM),
    )(x1, w1, b1, w2p, b2, w3, jnp.asarray(mask_np), jnp.asarray(g_np),
      jnp.asarray(sel_np), b3)


# ---------------- plain-JAX reference (for correctness check) ----------------
def _ref_conv1d(x, w, b):  # x: (N, Cin, L), w: (Cout, Cin, K), b: (Cout,)
    n, c, l = x.shape
    o, _, k = w.shape
    lout = l - k + 1
    windows = jnp.stack([x[:, :, i:i + lout] for i in range(k)], axis=-1)
    return jnp.einsum('nclk,ock->nol', windows, w) + b[None, :, None]


def _ref_forward(x, c1w, c1b, c2w, c2b, fw, fb):
    y = jax.nn.relu(_ref_conv1d(x, c1w, c1b))
    y = y.reshape(y.shape[0], y.shape[1], -1, 2).max(-1)
    y = jax.nn.relu(_ref_conv1d(y, c2w, c2b))
    y = y.reshape(y.shape[0], y.shape[1], -1, 2).max(-1)
    y = y.reshape(y.shape[0], -1)                               # (N, 6*21)
    return y @ fw.T + fb


if __name__ == "__main__":
    key = jax.random.PRNGKey(0)
    ks = jax.random.split(key, 7)

    def u(k, shape, fan_in):
        bound = 1.0 / np.sqrt(fan_in)
        return jax.random.uniform(k, shape, jnp.float32, -bound, bound)

    # Deterministic parameter init (PyTorch-style fan-in uniform).
    conv1_w = u(ks[0], (C1, C_IN, K1), C_IN * K1)
    conv1_b = u(ks[1], (C1,), C_IN * K1)
    conv2_w = u(ks[2], (C2, C1, K2), C1 * K2)
    conv2_b = u(ks[3], (C2,), C1 * K2)
    fc3_w = u(ks[4], (N_OUT, C2 * P2), C2 * P2)
    fc3_b = u(ks[5], (N_OUT,), C2 * P2)

    x = jax.random.normal(ks[6], (N_BATCH, C_IN, L_IN), jnp.float32)

    out = net_forward(x, conv1_w, conv1_b, conv2_w, conv2_b, fc3_w, fc3_b)
    out = jax.block_until_ready(out)

    ref = _ref_forward(x, conv1_w, conv1_b, conv2_w, conv2_b, fc3_w, fc3_b)
    np.testing.assert_allclose(np.asarray(out), np.asarray(ref),
                               rtol=1e-4, atol=1e-4)
    print("KERNEL_OK")
</pallas_src>

<mosaic_0001>
module attributes {stable_mosaic.version = 11 : i64} {
  func.func @net_kernel(%arg0: memref<224x180xf32, #tpu.memory_space<vmem>>, %arg1: memref<180x3xf32, #tpu.memory_space<vmem>>, %arg2: memref<1x3xf32, #tpu.memory_space<vmem>>, %arg3: memref<8x3x12xf32, #tpu.memory_space<vmem>>, %arg4: memref<1x6xf32, #tpu.memory_space<vmem>>, %arg5: memref<6x126xf32, #tpu.memory_space<vmem>>, %arg6: memref<49x126xf32, #tpu.memory_space<vmem>>, %arg7: memref<126x6xf32, #tpu.memory_space<vmem>>, %arg8: memref<2x49xf32, #tpu.memory_space<vmem>>, %arg9: memref<1x6xf32, #tpu.memory_space<vmem>>, %arg10: memref<2x6xf32, #tpu.memory_space<vmem>>) attributes {dimension_semantics = [], scalar_prefetch = 0 : i64, scratch_operands = 0 : i64, tpu.core_type = #tpu.core_type<tc>} {
    %c0 = arith.constant 0 : index
    %c0_0 = arith.constant 0 : index
    %0 = vector.load %arg0[%c0, %c0_0] : memref<224x180xf32, #tpu.memory_space<vmem>>, vector<224x180xf32>
    %c0_1 = arith.constant 0 : index
    %c0_2 = arith.constant 0 : index
    %1 = vector.load %arg1[%c0_1, %c0_2] : memref<180x3xf32, #tpu.memory_space<vmem>>, vector<180x3xf32>
    %cst = arith.constant dense<0.000000e+00> : vector<224x3xf32>
    %2 = tpu.matmul %0, %1, %cst {dimension_numbers = #tpu.dot_dimension_numbers<[1], [0], [0], [1], [0, 0, 1, 1], [], []>} : vector<224x180xf32>, vector<180x3xf32>, vector<224x3xf32> -> vector<224x3xf32>
    %c0_3 = arith.constant 0 : index
    %c0_4 = arith.constant 0 : index
    %3 = vector.load %arg2[%c0_3, %c0_4] : memref<1x3xf32, #tpu.memory_space<vmem>>, vector<1x3xf32>
    %4 = vector.broadcast %3 : vector<1x3xf32> to vector<224x3xf32>
    %5 = arith.addf %2, %4 : vector<224x3xf32>
    %cst_5 = arith.constant 0.000000e+00 : f32
    %6 = vector.broadcast %cst_5 : f32 to vector<224x3xf32>
    %7 = arith.maximumf %5, %6 : vector<224x3xf32>
    %8 = vector.extract_strided_slice %7 {offsets = [0, 0], sizes = [112, 3], strides = [1, 1]} : vector<224x3xf32> to vector<112x3xf32>
    %9 = vector.extract_strided_slice %7 {offsets = [112, 0], sizes = [112, 3], strides = [1, 1]} : vector<224x3xf32> to vector<112x3xf32>
    %10 = arith.maximumf %8, %9 : vector<112x3xf32>
    %11 = vector.extract_strided_slice %10 {offsets = [0, 0], sizes = [105, 3], strides = [1, 1]} : vector<112x3xf32> to vector<105x3xf32>
    %c0_6 = arith.constant 0 : index
    %c0_7 = arith.constant 0 : index
    %c0_8 = arith.constant 0 : index
    %12 = vector.load %arg3[%c0_6, %c0_7, %c0_8] : memref<8x3x12xf32, #tpu.memory_space<vmem>>, vector<1x3x12xf32>
    %13 = vector.shape_cast %12 : vector<1x3x12xf32> to vector<3x12xf32>
    %cst_9 = arith.constant dense<0.000000e+00> : vector<105x12xf32>
    %14 = tpu.matmul %11, %13, %cst_9 {dimension_numbers = #tpu.dot_dimension_numbers<[1], [0], [0], [1], [0, 0, 1, 1], [], []>} : vector<105x3xf32>, vector<3x12xf32>, vector<105x12xf32> -> vector<105x12xf32>
    %15 = vector.extract_strided_slice %10 {offsets = [1, 0], sizes = [105, 3], strides = [1, 1]} : vector<112x3xf32> to vector<105x3xf32>
    %c1 = arith.constant 1 : index
    %c0_10 = arith.constant 0 : index
    %c0_11 = arith.constant 0 : index
    %16 = vector.load %arg3[%c1, %c0_10, %c0_11] : memref<8x3x12xf32, #tpu.memory_space<vmem>>, vector<1x3x12xf32>
    %17 = vector.shape_cast %16 : vector<1x3x12xf32> to vector<3x12xf32>
    %cst_12 = arith.constant dense<0.000000e+00> : vector<105x12xf32>
    %18 = tpu.matmul %15, %17, %cst_12 {dimension_numbers = #tpu.dot_dimension_numbers<[1], [0], [0], [1], [0, 0, 1, 1], [], []>} : vector<105x3xf32>, vector<3x12xf32>, vector<105x12xf32> -> vector<105x12xf32>
    %19 = arith.addf %14, %18 : vector<105x12xf32>
    %20 = vector.extract_strided_slice %10 {offsets = [2, 0], sizes = [105, 3], strides = [1, 1]} : vector<112x3xf32> to vector<105x3xf32>
    %c2 = arith.constant 2 : index
    %c0_13 = arith.constant 0 : index
    %c0_14 = arith.constant 0 : index
    %21 = vector.load %arg3[%c2, %c0_13, %c0_14] : memref<8x3x12xf32, #tpu.memory_space<vmem>>, vector<1x3x12xf32>
    %22 = vector.shape_cast %21 : vector<1x3x12xf32> to vector<3x12xf32>
    %cst_15 = arith.constant dense<0.000000e+00> : vector<105x12xf32>
    %23 = tpu.matmul %20, %22, %cst_15 {dimension_numbers = #tpu.dot_dimension_numbers<[1], [0], [0], [1], [0, 0, 1, 1], [], []>} : vector<105x3xf32>, vector<3x12xf32>, vector<105x12xf32> -> vector<105x12xf32>
    %24 = arith.addf %19, %23 : vector<105x12xf32>
    %25 = vector.extract_strided_slice %10 {offsets = [3, 0], sizes = [105, 3], strides = [1, 1]} : vector<112x3xf32> to vector<105x3xf32>
    %c3 = arith.constant 3 : index
    %c0_16 = arith.constant 0 : index
    %c0_17 = arith.constant 0 : index
    %26 = vector.load %arg3[%c3, %c0_16, %c0_17] : memref<8x3x12xf32, #tpu.memory_space<vmem>>, vector<1x3x12xf32>
    %27 = vector.shape_cast %26 : vector<1x3x12xf32> to vector<3x12xf32>
    %cst_18 = arith.constant dense<0.000000e+00> : vector<105x12xf32>
    %28 = tpu.matmul %25, %27, %cst_18 {dimension_numbers = #tpu.dot_dimension_numbers<[1], [0], [0], [1], [0, 0, 1, 1], [], []>} : vector<105x3xf32>, vector<3x12xf32>, vector<105x12xf32> -> vector<105x12xf32>
    %29 = arith.addf %24, %28 : vector<105x12xf32>
    %30 = vector.extract_strided_slice %10 {offsets = [4, 0], sizes = [105, 3], strides = [1, 1]} : vector<112x3xf32> to vector<105x3xf32>
    %c4 = arith.constant 4 : index
    %c0_19 = arith.constant 0 : index
    %c0_20 = arith.constant 0 : index
    %31 = vector.load %arg3[%c4, %c0_19, %c0_20] : memref<8x3x12xf32, #tpu.memory_space<vmem>>, vector<1x3x12xf32>
    %32 = vector.shape_cast %31 : vector<1x3x12xf32> to vector<3x12xf32>
    %cst_21 = arith.constant dense<0.000000e+00> : vector<105x12xf32>
    %33 = tpu.matmul %30, %32, %cst_21 {dimension_numbers = #tpu.dot_dimension_numbers<[1], [0], [0], [1], [0, 0, 1, 1], [], []>} : vector<105x3xf32>, vector<3x12xf32>, vector<105x12xf32> -> vector<105x12xf32>
    %34 = arith.addf %29, %33 : vector<105x12xf32>
    %35 = vector.extract_strided_slice %10 {offsets = [5, 0], sizes = [105, 3], strides = [1, 1]} : vector<112x3xf32> to vector<105x3xf32>
    %c5 = arith.constant 5 : index
    %c0_22 = arith.constant 0 : index
    %c0_23 = arith.constant 0 : index
    %36 = vector.load %arg3[%c5, %c0_22, %c0_23] : memref<8x3x12xf32, #tpu.memory_space<vmem>>, vector<1x3x12xf32>
    %37 = vector.shape_cast %36 : vector<1x3x12xf32> to vector<3x12xf32>
    %cst_24 = arith.constant dense<0.000000e+00> : vector<105x12xf32>
    %38 = tpu.matmul %35, %37, %cst_24 {dimension_numbers = #tpu.dot_dimension_numbers<[1], [0], [0], [1], [0, 0, 1, 1], [], []>} : vector<105x3xf32>, vector<3x12xf32>, vector<105x12xf32> -> vector<105x12xf32>
    %39 = arith.addf %34, %38 : vector<105x12xf32>
    %40 = vector.extract_strided_slice %10 {offsets = [6, 0], sizes = [105, 3], strides = [1, 1]} : vector<112x3xf32> to vector<105x3xf32>
    %c6 = arith.constant 6 : index
    %c0_25 = arith.constant 0 : index
    %c0_26 = arith.constant 0 : index
    %41 = vector.load %arg3[%c6, %c0_25, %c0_26] : memref<8x3x12xf32, #tpu.memory_space<vmem>>, vector<1x3x12xf32>
    %42 = vector.shape_cast %41 : vector<1x3x12xf32> to vector<3x12xf32>
    %cst_27 = arith.constant dense<0.000000e+00> : vector<105x12xf32>
    %43 = tpu.matmul %40, %42, %cst_27 {dimension_numbers = #tpu.dot_dimension_numbers<[1], [0], [0], [1], [0, 0, 1, 1], [], []>} : vector<105x3xf32>, vector<3x12xf32>, vector<105x12xf32> -> vector<105x12xf32>
    %44 = arith.addf %39, %43 : vector<105x12xf32>
    %45 = vector.extract_strided_slice %10 {offsets = [7, 0], sizes = [105, 3], strides = [1, 1]} : vector<112x3xf32> to vector<105x3xf32>
    %c7 = arith.constant 7 : index
    %c0_28 = arith.constant 0 : index
    %c0_29 = arith.constant 0 : index
    %46 = vector.load %arg3[%c7, %c0_28, %c0_29] : memref<8x3x12xf32, #tpu.memory_space<vmem>>, vector<1x3x12xf32>
    %47 = vector.shape_cast %46 : vector<1x3x12xf32> to vector<3x12xf32>
    %cst_30 = arith.constant dense<0.000000e+00> : vector<105x12xf32>
    %48 = tpu.matmul %45, %47, %cst_30 {dimension_numbers = #tpu.dot_dimension_numbers<[1], [0], [0], [1], [0, 0, 1, 1], [], []>} : vector<105x3xf32>, vector<3x12xf32>, vector<105x12xf32> -> vector<105x12xf32>
    %49 = arith.addf %44, %48 : vector<105x12xf32>
    %50 = vector.extract_strided_slice %49 {offsets = [0, 0], sizes = [105, 6], strides = [1, 1]} : vector<105x12xf32> to vector<105x6xf32>
    %51 = vector.extract_strided_slice %49 {offsets = [0, 6], sizes = [105, 6], strides = [1, 1]} : vector<105x12xf32> to vector<105x6xf32>
    %52 = vector.extract_strided_slice %50 {offsets = [0, 0], sizes = [49, 6], strides = [1, 1]} : vector<105x6xf32> to vector<49x6xf32>
    %53 = vector.extract_strided_slice %51 {offsets = [56, 0], sizes = [49, 6], strides = [1, 1]} : vector<105x6xf32> to vector<49x6xf32>
    %54 = arith.addf %52, %53 : vector<49x6xf32>
    %55 = vector.extract_strided_slice %50 {offsets = [56, 0], sizes = [49, 6], strides = [1, 1]} : vector<105x6xf32> to vector<49x6xf32>
    %56 = vector.extract_strided_slice %51 {offsets = [1, 0], sizes = [49, 6], strides = [1, 1]} : vector<105x6xf32> to vector<49x6xf32>
    %57 = arith.addf %55, %56 : vector<49x6xf32>
    %c0_31 = arith.constant 0 : index
    %c0_32 = arith.constant 0 : index
    %58 = vector.load %arg4[%c0_31, %c0_32] : memref<1x6xf32, #tpu.memory_space<vmem>>, vector<1x6xf32>
    %59 = vector.broadcast %58 : vector<1x6xf32> to vector<49x6xf32>
    %60 = arith.addf %54, %59 : vector<49x6xf32>
    %cst_33 = arith.constant 0.000000e+00 : f32
    %61 = vector.broadcast %cst_33 : f32 to vector<49x6xf32>
    %62 = arith.maximumf %60, %61 : vector<49x6xf32>
    %c0_34 = arith.constant 0 : index
    %c0_35 = arith.constant 0 : index
    %63 = vector.load %arg4[%c0_34, %c0_35] : memref<1x6xf32, #tpu.memory_space<vmem>>, vector<1x6xf32>
    %64 = vector.broadcast %63 : vector<1x6xf32> to vector<49x6xf32>
    %65 = arith.addf %57, %64 : vector<49x6xf32>
    %cst_36 = arith.constant 0.000000e+00 : f32
    %66 = vector.broadcast %cst_36 : f32 to vector<49x6xf32>
    %67 = arith.maximumf %65, %66 : vector<49x6xf32>
    %68 = arith.maximumf %62, %67 : vector<49x6xf32>
    %c0_37 = arith.constant 0 : index
    %c0_38 = arith.constant 0 : index
    %69 = vector.load %arg5[%c0_37, %c0_38] : memref<6x126xf32, #tpu.memory_space<vmem>>, vector<6x126xf32>
    %cst_39 = arith.constant dense<0.000000e+00> : vector<49x126xf32>
    %70 = tpu.matmul %68, %69, %cst_39 {dimension_numbers = #tpu.dot_dimension_numbers<[1], [0], [0], [1], [0, 0, 1, 1], [], []>} : vector<49x6xf32>, vector<6x126xf32>, vector<49x126xf32> -> vector<49x126xf32>
    %c0_40 = arith.constant 0 : index
    %c0_41 = arith.constant 0 : index
    %71 = vector.load %arg6[%c0_40, %c0_41] : memref<49x126xf32, #tpu.memory_space<vmem>>, vector<49x126xf32>
    %72 = arith.mulf %70, %71 : vector<49x126xf32>
    %c0_42 = arith.constant 0 : index
    %c0_43 = arith.constant 0 : index
    %73 = vector.load %arg7[%c0_42, %c0_43] : memref<126x6xf32, #tpu.memory_space<vmem>>, vector<126x6xf32>
    %cst_44 = arith.constant dense<0.000000e+00> : vector<49x6xf32>
    %74 = tpu.matmul %72, %73, %cst_44 {dimension_numbers = #tpu.dot_dimension_numbers<[1], [0], [0], [1], [0, 0, 1, 1], [], []>} : vector<49x126xf32>, vector<126x6xf32>, vector<49x6xf32> -> vector<49x6xf32>
    %c0_45 = arith.constant 0 : index
    %c0_46 = arith.constant 0 : index
    %75 = vector.load %arg8[%c0_45, %c0_46] : memref<2x49xf32, #tpu.memory_space<vmem>>, vector<2x49xf32>
    %cst_47 = arith.constant dense<0.000000e+00> : vector<2x6xf32>
    %76 = tpu.matmul %75, %74, %cst_47 {dimension_numbers = #tpu.dot_dimension_numbers<[1], [0], [0], [1], [0, 0, 1, 1], [], []>} : vector<2x49xf32>, vector<49x6xf32>, vector<2x6xf32> -> vector<2x6xf32>
    %c0_48 = arith.constant 0 : index
    %c0_49 = arith.constant 0 : index
    %77 = vector.load %arg9[%c0_48, %c0_49] : memref<1x6xf32, #tpu.memory_space<vmem>>, vector<1x6xf32>
    %78 = vector.broadcast %77 : vector<1x6xf32> to vector<2x6xf32>
    %79 = arith.addf %76, %78 : vector<2x6xf32>
    %c0_50 = arith.constant 0 : index
    %c0_51 = arith.constant 0 : index
    %80 = vector.load %arg10[%c0_50, %c0_51] : memref<2x6xf32, #tpu.memory_space<vmem>>, vector<2x6xf32>
    tpu.vector_store %arg10[%c0_50, %c0_51], %79 {strides = array<i32>} : memref<2x6xf32, #tpu.memory_space<vmem>>, vector<2x6xf32>,
    return
  }
}

</mosaic_0001>

<bundles_post_ra>
// kernel: net_forward.1
= control target key start
LH: loop header
LB: loop body
LE: loop exit
PB: predicated region body
PF: predicated region fallthrough
CT: control target
= control target key end

     0   :  { %vm204_vm0 = vcmask 1043456   ;;  %s3316_s0 = inlined_call_operand.vmem [shape: f32[224,180], index: 0, kind: input, shape index: {}]   ;;  %s3317_s1 = inlined_call_operand.vmem [shape: f32[180,3], index: 1, kind: input, shape index: {}]   ;;  %s3318_s2 = inlined_call_operand.vmem [shape: f32[1,3], index: 2, kind: input, shape index: {}]   ;;  %s3319_s3 = inlined_call_operand.vmem [shape: f32[8,3,12], index: 3, kind: input, shape index: {}]   ;;  %s3320_s4 = inlined_call_operand.vmem [shape: f32[1,6], index: 4, kind: input, shape index: {}]   ;;  %s3321_s5 = inlined_call_operand.vmem [shape: f32[6,126], index: 5, kind: input, shape index: {}]   ;;  %s3322_s6 = inlined_call_operand.vmem [shape: f32[49,126], index: 6, kind: input, shape index: {}]   ;;  %s3323_s7 = inlined_call_operand.vmem [shape: f32[126,6], index: 7, kind: input, shape index: {}]   ;;  %s3324_s8 = inlined_call_operand.vmem [shape: f32[2,49], index: 8, kind: input, shape index: {}]   ;;  %s3325_s9 = inlined_call_operand.vmem [shape: f32[1,6], index: 9, kind: input, shape index: {}]   ;;  %s3326_s10 = inlined_call_operand.hbm [shape: f32[2,6], index: 10, kind: output, shape index: {}]  }
   0x1   :  { %v107_v0 = vld [vmem:[%s3317_s1 + $0x78] sm:$0xff]  ;;  %v106_v1 = vld [vmem:[%s3317_s1 + $0x70] sm:$0xff]  ;;  %v105_v2 = vld [vmem:[%s3317_s1 + $0x68] sm:$0xff] }
   0x2   :  { %208 = vmatpush.msra.mxu0 %v107_v0  ;;  %v114_v3 = vld [vmem:[%s3317_s1 + $0xb0] sm:$0xf]  ;;  %v104_v4 = vld [vmem:[%s3317_s1 + $0x60] sm:$0xff]  ;;  %v113_v5 = vld [vmem:[%s3317_s1 + $0xa8] sm:$0xff] }
   0x3   :  { %1810 = vmatpush.msk.msra.mxu1 %vm204_vm0, %v114_v3  ;;  %v112_v6 = vld [vmem:[%s3317_s1 + $0xa0] sm:$0xff]  ;;  %v103_v7 = vld [vmem:[%s3317_s1 + $0x58] sm:$0xff]  ;;  %v102_v9 = vld [vmem:[%s3317_s1 + $0x50] sm:$0xff] }
   0x4   :  { %209 = vmatpush.msra.mxu0 %v106_v1  ;;  %v111_v8 = vld [vmem:[%s3317_s1 + $0x98] sm:$0xff]  ;;  %v110_v10 = vld [vmem:[%s3317_s1 + $0x90] sm:$0xff]  ;;  %v101_v11 = vld [vmem:[%s3317_s1 + $0x48] sm:$0xff] }
   0x5   :  { %319 = vmatpush.msra.mxu1 %v113_v5 }
   0x6   :  { %210 = vmatpush.msra.mxu0 %v105_v2 }
   0x7   :  { %320 = vmatpush.msra.mxu1 %v112_v6 }
   0x8   :  { %211 = vmatpush.msra.mxu0 %v104_v4 }
   0x9   :  { %321 = vmatpush.msra.mxu1 %v111_v8 }
   0xa   :  { %212 = vmatpush.msra.mxu0 %v103_v7 }
   0xb   :  { %15 = vsyncpa [#allocation3], 0  ;;  %v109_v12 = vld [vmem:[%s3317_s1 + $0x88] sm:$0xff]  ;;  %v100_v13 = vld [vmem:[%s3317_s1 + $0x40] sm:$0xff]  ;;  %322 = vmatpush.msra.mxu1 %v110_v10  ;;  %vm119_vm1 = vcmask 424960   ;;  %vm526_vm2 = vcmask 1042432  }
   0xc   :  { %213 = vmatpush.msra.mxu0 %v102_v9  ;;  %v108_v14 = vld [vmem:[%s3317_s1 + $0x80] sm:$0xff]  ;;  %v99_v15 = vld [vmem:[%s3317_s1 + $0x38] sm:$0xff]  ;;  %v37_v16 = vld [vmem:[%s3316_s0 + $0x8] sm:$0xff]  ;;  %vm497_vm3 = vcmask 23552   ;;  %vm469_vm4 = vcmask 1046528   ;;  %vm1349_vm5 = vcmask 1040384  }
   0xd   :  { %323 = vmatpush.msra.mxu1 %v109_v12  ;;  %v98_v17 = vld [vmem:[%s3317_s1 + $0x30] sm:$0xff]  ;;  %v97_v18 = vld [vmem:[%s3317_s1 + $0x28] sm:$0xff]  ;;  %v96_v19 = vld [vmem:[%s3317_s1 + $0x20] sm:$0xff]  ;;  %vm1215_vm6 = vcmask 1041408   ;;  %vm815_vm7 = vcmask 1044480   ;;  %vm681_vm8 = vcmask 1045504  }
   0xe   :  { %214 = vmatpush.msra.mxu0 %v101_v11  ;;  %v95_v20 = vld [vmem:[%s3317_s1 + $0x18] sm:$0xff]  ;;  %v94_v22 = vld [vmem:[%s3317_s1 + $0x10] sm:$0xff]  ;;  %v93_v23 = vld [vmem:[%s3317_s1 + $0x8] sm:$0xff]  ;;  %vm1604_vm9 = vcmask 48128   ;;  %vm1697_vm10 = vcmask 1031168   ;;  %vm1765_vm11 = vcmask 400384  }
   0xf   :  { %324 = vmatpush.msra.mxu1 %v108_v14  ;;  %v39_v21 = vld [vmem:[%s3316_s0 + $0x18] sm:$0xff]  ;;  %v92_v24 = vld [vmem:[%s3317_s1] sm:$0xff]  ;;  %v41_v26 = vld [vmem:[%s3316_s0 + $0x28] sm:$0xff]  ;;  %s2019_s21 = smov [#allocation2]   ;;  %vm1792_vm12 = vcmask 41984  }
  0x10   :  { %215 = vmatpush.msra.mxu0 %v100_v13  ;;  %1811 = vmatmul.msk.f32.vlgmr.msra.gmra.mxu1 %vm119_vm1, %v37_v16  ;;  %v36_v25 = vld [vmem:[%s3316_s0] sm:$0xff]  ;;  %v38_v27 = vld [vmem:[%s3316_s0 + $0x10] sm:$0xff]  ;;  %v43_v28 = vld [vmem:[%s3316_s0 + $0x38] sm:$0xff]  ;;  %s1799_s22 = sshll.u32 %s2019_s21, 4  ;;  %s1800_s22 = int_to_ptr.vmem [resolvable:$true] %s1799_s22 }
  0x11   :  { %v40_v29 = vld [vmem:[%s3316_s0 + $0x20] sm:$0xff]  ;;  %v45_v30 = vld [vmem:[%s3316_s0 + $0x48] sm:$0xff]  ;;  %v42_v31 = vld [vmem:[%s3316_s0 + $0x30] sm:$0xff] }
  0x12   :  { %216 = vmatpush.msra.mxu0 %v99_v15  ;;  %v47_v32 = vld [vmem:[%s3316_s0 + $0x58] sm:$0xff]  ;;  %v44_v33 = vld [vmem:[%s3316_s0 + $0x40] sm:$0xff]  ;;  %v49_v34 = vld [vmem:[%s3316_s0 + $0x68] sm:$0xff] }
  0x13   :  { %v46_v35 = vld [vmem:[%s3316_s0 + $0x50] sm:$0xff]  ;;  %v51_v36 = vld [vmem:[%s3316_s0 + $0x78] sm:$0xff]  ;;  %v48_v37 = vld [vmem:[%s3316_s0 + $0x60] sm:$0xff] }
  0x14   :  { %217 = vmatpush.msra.mxu0 %v98_v17  ;;  %v53_v38 = vld [vmem:[%s3316_s0 + $0x88] sm:$0xff]  ;;  %v50_v39 = vld [vmem:[%s3316_s0 + $0x70] sm:$0xff]  ;;  %v55_v40 = vld [vmem:[%s3316_s0 + $0x98] sm:$0xff] }
  0x15   :  { %v52_v41 = vld [vmem:[%s3316_s0 + $0x80] sm:$0xff]  ;;  %v57_v42 = vld [vmem:[%s3316_s0 + $0xa8] sm:$0xff]  ;;  %v54_v43 = vld [vmem:[%s3316_s0 + $0x90] sm:$0xff] }
  0x16   :  { %218 = vmatpush.msra.mxu0 %v97_v18  ;;  %v59_v44 = vld [vmem:[%s3316_s0 + $0xb8] sm:$0xff]  ;;  %v56_v45 = vld [vmem:[%s3316_s0 + $0xa0] sm:$0xff]  ;;  %v61_v46 = vld [vmem:[%s3316_s0 + $0xc8] sm:$0xff] }
  0x17   :  { %v58_v47 = vld [vmem:[%s3316_s0 + $0xb0] sm:$0xff]  ;;  %v63_v48 = vld [vmem:[%s3316_s0 + $0xd8] sm:$0xff]  ;;  %v60_v49 = vld [vmem:[%s3316_s0 + $0xc0] sm:$0xff] }
  0x18   :  { %219 = vmatpush.msra.mxu0 %v96_v19  ;;  %1812 = vmatmul.msk.f32.gmra.mxu1 %vm119_vm1, %v39_v21  ;;  %v65_v50 = vld [vmem:[%s3316_s0 + $0xe8] sm:$0xff]  ;;  %v62_v51 = vld [vmem:[%s3316_s0 + $0xd0] sm:$0xff]  ;;  %v67_v52 = vld [vmem:[%s3316_s0 + $0xf8] sm:$0xff] }
  0x19   :  { %v64_v53 = vld [vmem:[%s3316_s0 + $0xe0] sm:$0xff]  ;;  %v69_v55 = vld [vmem:[%s3316_s0 + $0x108] sm:$0xff]  ;;  %v66_v56 = vld [vmem:[%s3316_s0 + $0xf0] sm:$0xff] }
  0x1a   :  { %220 = vmatpush.msra.mxu0 %v95_v20  ;;  %v71_v58 = vld [vmem:[%s3316_s0 + $0x118] sm:$0xff]  ;;  %v68_v60 = vld [vmem:[%s3316_s0 + $0x100] sm:$0xff]  ;;  %v73_v62 = vld [vmem:[%s3316_s0 + $0x128] sm:$0xff] }
  0x1b   :  { %v70_v0 = vld [vmem:[%s3316_s0 + $0x110] sm:$0xff]  ;;  %v75_v2 = vld [vmem:[%s3316_s0 + $0x138] sm:$0xff]  ;;  %v72_v4 = vld [vmem:[%s3316_s0 + $0x120] sm:$0xff] }
  0x1c   :  { %221 = vmatpush.msra.mxu0 %v94_v22  ;;  %v77_v6 = vld [vmem:[%s3316_s0 + $0x148] sm:$0xff]  ;;  %v74_v8 = vld [vmem:[%s3316_s0 + $0x130] sm:$0xff]  ;;  %v79_v10 = vld [vmem:[%s3316_s0 + $0x158] sm:$0xff] }
  0x1d   :  { %v76_v12 = vld [vmem:[%s3316_s0 + $0x140] sm:$0xff]  ;;  %v81_v14 = vld [vmem:[%s3316_s0 + $0x168] sm:$0xff]  ;;  %v78_v16 = vld [vmem:[%s3316_s0 + $0x150] sm:$0xff] }
  0x1e   :  { %222 = vmatpush.msra.mxu0 %v93_v23  ;;  %v83_v18 = vld [vmem:[%s3316_s0 + $0x178] sm:$0xff]  ;;  %v80_v20 = vld [vmem:[%s3316_s0 + $0x160] sm:$0xff]  ;;  %v85_v22 = vld [vmem:[%s3316_s0 + $0x188] sm:$0xff] }
  0x20   :  { %223 = vmatpush.msra.mxu0 %v92_v24  ;;  %1813 = vmatmul.msk.f32.gmra.mxu1 %vm119_vm1, %v41_v26  ;;  %v82_v24 = vld [vmem:[%s3316_s0 + $0x170] sm:$0xff]  ;;  %v87_v26 = vld [vmem:[%s3316_s0 + $0x198] sm:$0xff] }
  0x21   :  { %224 = vmatmul.f32.vlgmr.msra.gmra.mxu0 %v36_v25 }
  0x28   :  { %1814 = vmatmul.msk.f32.gmra.mxu1 %vm119_vm1, %v43_v28  ;;  %v84_v28 = vld [vmem:[%s3316_s0 + $0x180] sm:$0xff] }
  0x29   :  { %227 = vmatmul.f32.gmra.mxu0 %v38_v27 }
  0x30   :  { %1815 = vmatmul.msk.f32.gmra.mxu1 %vm119_vm1, %v45_v30  ;;  %v89_v30 = vld [vmem:[%s3316_s0 + $0x1a8] sm:$0xff] }
  0x31   :  { %230 = vmatmul.f32.gmra.mxu0 %v40_v29 }
  0x38   :  { %1816 = vmatmul.msk.f32.gmra.mxu1 %vm119_vm1, %v47_v32  ;;  %v86_v32 = vld [vmem:[%s3316_s0 + $0x190] sm:$0xff] }
  0x39   :  { %233 = vmatmul.f32.gmra.mxu0 %v42_v31 }
  0x40   :  { %1817 = vmatmul.msk.f32.gmra.mxu1 %vm119_vm1, %v49_v34  ;;  %v91_v34 = vld [vmem:[%s3316_s0 + $0x1b8] sm:$0xff] }
  0x41   :  { %236 = vmatmul.f32.gmra.mxu0 %v44_v33 }
  0x48   :  { %1818 = vmatmul.msk.f32.gmra.mxu1 %vm119_vm1, %v51_v36  ;;  %v88_v36 = vld [vmem:[%s3316_s0 + $0x1a0] sm:$0xff] }
  0x49   :  { %239 = vmatmul.f32.gmra.mxu0 %v46_v35 }
  0x50   :  { %1819 = vmatmul.msk.f32.gmra.mxu1 %vm119_vm1, %v53_v38  ;;  %v452_v38 = vld [vmem:[%s3319_s3] sm:$0x7] }
  0x51   :  { %242 = vmatmul.f32.gmra.mxu0 %v48_v37  ;;  %1986 = vmatpush.msk.msra.mxu3 %vm526_vm2, %v452_v38 }
  0x52   :  { %1855 = vmatpush.msk.msrb.mxu0 %vm526_vm2, %v452_v38 }
  0x58   :  { %1820 = vmatmul.msk.f32.gmra.mxu1 %vm119_vm1, %v55_v40  ;;  %v90_v40 = vld [vmem:[%s3316_s0 + $0x1b0] sm:$0xff] }
  0x59   :  { %245 = vmatmul.f32.gmra.mxu0 %v50_v39 }
  0x60   :  { %1821 = vmatmul.msk.f32.gmra.mxu1 %vm119_vm1, %v57_v42 }
  0x61   :  { %248 = vmatmul.f32.gmra.mxu0 %v52_v41 }
  0x68   :  { %1822 = vmatmul.msk.f32.gmra.mxu1 %vm119_vm1, %v59_v44  ;;  %v1839_v44 = vld [vmem:[%s3319_s3 + $0x4] sm:$0x7] }
  0x69   :  { %251 = vmatmul.f32.gmra.mxu0 %v54_v43  ;;  %1840 = vmatpush.msk.msrb.mxu1 %vm526_vm2, %v1839_v44 }
  0x6a   :  { %1984 = vmatpush.msk.msra.mxu2 %vm526_vm2, %v1839_v44 }
  0x6b   :  { %1985 = vmatpush.msk.msra.mxu1 %vm526_vm2, %v452_v38 }
  0x70   :  { %1823 = vmatmul.msk.f32.gmra.mxu1 %vm119_vm1, %v61_v46 }
  0x71   :  { %254 = vmatmul.f32.gmra.mxu0 %v56_v45  ;;  %v1950_v45 = vld [vmem:[%s3319_s3 + $0x1c] sm:$0x7] }
  0x72   :  { %1951 = vmatpush.msk.msra.mxu0 %vm526_vm2, %v1950_v45 }
  0x78   :  { %1824 = vmatmul.msk.f32.gmra.mxu1 %vm119_vm1, %v63_v48 }
  0x79   :  { %257 = vmatmul.f32.gmra.mxu0 %v58_v47  ;;  %v2415_v47 = vld [vmem:[%s3318_s2] ss:$0 sm:$0xff] }
  0x80   :  { %1825 = vmatmul.msk.f32.gmra.mxu1 %vm119_vm1, %v65_v50 }
  0x81   :  { %260 = vmatmul.f32.gmra.mxu0 %v60_v49 }
  0x88   :  { %1826 = vmatmul.msk.f32.gmra.mxu1 %vm119_vm1, %v67_v52 }
  0x89   :  { %263 = vmatmul.f32.gmra.mxu0 %v62_v51 }
  0x8d   :  { %v2254_v54 = vpop.f32.mrf.mxu1 }
  0x90   :  { %1827 = vmatmul.msk.f32.gmra.mxu1 %vm119_vm1, %v69_v55 }
  0x91   :  { %266 = vmatmul.f32.gmra.mxu0 %v64_v53 }
  0x95   :  { %v2263_v57 = vpop.f32.mrf.mxu1 }
  0x98   :  { %1828 = vmatmul.msk.f32.gmra.mxu1 %vm119_vm1, %v71_v58 }
  0x99   :  { %269 = vmatmul.f32.gmra.mxu0 %v66_v56 }
  0x9d   :  { %v2274_v61 = vpop.f32.mrf.mxu1 }
  0x9e   :  { %v2269_v59 = vpop.f32.mrf.mxu0 }
  0x9f   :  { %v226_v49 = vadd.f32 %v2415_v47, %v2269_v59 }
  0xa0   :  { %1829 = vmatmul.msk.f32.gmra.mxu1 %vm119_vm1, %v73_v62 }
  0xa1   :  { %272 = vmatmul.f32.gmra.mxu0 %v68_v60  ;;  %v327_v51 = vadd.f32 %v2254_v54, %v226_v49 }
  0xa3   :  { %v410_v58 = vmax.f32 %v327_v51, 0.0 }
  0xa5   :  { %v2285_v1 = vpop.f32.mrf.mxu1 }
  0xa6   :  { %v2280_v63 = vpop.f32.mrf.mxu0 }
  0xa7   :  { %v229_v56 = vadd.f32 %v2415_v47, %v2280_v63 }
  0xa8   :  { %1830 = vmatmul.msk.f32.gmra.mxu1 %vm119_vm1, %v75_v2 }
  0xa9   :  { %275 = vmatmul.f32.gmra.mxu0 %v70_v0  ;;  %v330_v0 = vadd.f32 %v2263_v57, %v229_v56 }
  0xad   :  { %v2296_v5 = vpop.f32.mrf.mxu1 }
  0xae   :  { %v2291_v3 = vpop.f32.mrf.mxu0 }
  0xaf   :  { %v232_v59 = vadd.f32 %v2415_v47, %v2291_v3 }
  0xb0   :  { %1831 = vmatmul.msk.f32.gmra.mxu1 %vm119_vm1, %v77_v6 }
  0xb1   :  { %278 = vmatmul.f32.gmra.mxu0 %v72_v4 }
  0xb5   :  { %v2307_v9 = vpop.f32.mrf.mxu1 }
  0xb6   :  { %v2302_v7 = vpop.f32.mrf.mxu0 }
  0xb7   :  { %v235_v63 = vadd.f32 %v2415_v47, %v2302_v7 }
  0xb8   :  { %1832 = vmatmul.msk.f32.gmra.mxu1 %vm119_vm1, %v79_v10  ;;  %v333_v10 = vadd.f32 %v2274_v61, %v232_v59 }
  0xb9   :  { %281 = vmatmul.f32.gmra.mxu0 %v74_v8  ;;  %v411_v8 = vmax.f32 %v330_v0, 0.0 }
  0xbd   :  { %v2318_v13 = vpop.f32.mrf.mxu1 }
  0xbe   :  { %v2313_v11 = vpop.f32.mrf.mxu0 }
  0xc0   :  { %1833 = vmatmul.msk.f32.gmra.mxu1 %vm119_vm1, %v81_v14 }
  0xc1   :  { %284 = vmatmul.f32.gmra.mxu0 %v76_v12 }
  0xc5   :  { %v2329_v17 = vpop.f32.mrf.mxu1 }
  0xc6   :  { %v2324_v15 = vpop.f32.mrf.mxu0 }
  0xc8   :  { %1834 = vmatmul.msk.f32.gmra.mxu1 %vm119_vm1, %v83_v18 }
  0xc9   :  { %287 = vmatmul.f32.gmra.mxu0 %v78_v16 }
  0xcd   :  { %v2340_v21 = vpop.f32.mrf.mxu1 }
  0xce   :  { %v2335_v19 = vpop.f32.mrf.mxu0 }
  0xd0   :  { %1835 = vmatmul.msk.f32.gmra.mxu1 %vm119_vm1, %v85_v22 }
  0xd1   :  { %290 = vmatmul.f32.gmra.mxu0 %v80_v20 }
  0xd5   :  { %v2351_v25 = vpop.f32.mrf.mxu1 }
  0xd6   :  { %v2346_v23 = vpop.f32.mrf.mxu0 }
  0xd8   :  { %1836 = vmatmul.msk.f32.gmra.mxu1 %vm119_vm1, %v87_v26 }
  0xd9   :  { %293 = vmatmul.f32.gmra.mxu0 %v82_v24 }
  0xdd   :  { %v2362_v29 = vpop.f32.mrf.mxu1 }
  0xde   :  { %v2357_v27 = vpop.f32.mrf.mxu0 }
  0xe0   :  { %1837 = vmatmul.msk.f32.gmra.mxu1 %vm119_vm1, %v89_v30 }
  0xe1   :  { %296 = vmatmul.f32.gmra.mxu0 %v84_v28 }
  0xe5   :  { %v2373_v33 = vpop.f32.mrf.mxu1 }
  0xe6   :  { %v2368_v31 = vpop.f32.mrf.mxu0 }
  0xe8   :  { %1838 = vmatmul.msk.f32.gmra.mxu1 %vm119_vm1, %v91_v34  ;;  %v1934_v34 = vld [vmem:[%s3319_s3 + $0x18] sm:$0x7] }
  0xe9   :  { %299 = vmatmul.f32.gmra.mxu0 %v86_v32 }
  0xed   :  { %v2384_v37 = vpop.f32.mrf.mxu1 }
  0xee   :  { %v2379_v35 = vpop.f32.mrf.mxu0 }
  0xf1   :  { %302 = vmatmul.f32.gmra.mxu0 %v88_v36 }
  0xf5   :  { %v2396_v41 = vpop.f32.mrf.mxu1 }
  0xf6   :  { %v2389_v39 = vpop.f32.mrf.mxu0 }
  0xf9   :  { %305 = vmatmul.f32.gmra.mxu0 %v90_v40 }
  0xfd   :  { %v368_v43 = vpop.f32.mrf.mxu1 }
  0xfe   :  { %v2398_v42 = vpop.f32.mrf.mxu0 }
 0x105   :  { %v371_v48 = vpop.f32.mrf.mxu1 }
 0x106   :  { %v2410_v46 = vpop.f32.mrf.mxu0 }
 0x10d   :  { %v374_v53 = vpop.f32.mrf.mxu1 }
 0x10e   :  { %v267_v50 = vpop.f32.mrf.mxu0 }
 0x10f   :  { %v268_v52 = vadd.f32 %v2415_v47, %v267_v50 }
 0x111   :  { %v369_v55 = vadd.f32 %v368_v43, %v268_v52 }
 0x113   :  { %v424_v60 = vmax.f32 %v369_v55, 0.0 }
 0x115   :  { %v438_v62 = vmax.f32 %v410_v58, %v424_v60  ;;  %v377_v54 = vpop.f32.mrf.mxu1  ;;  %v336_v60 = vadd.f32 %v2285_v1, %v235_v63 }
 0x116   :  { %v270_v2 = vpop.f32.mrf.mxu0 }
 0x117   :  { %v271_v4 = vadd.f32 %v2415_v47, %v270_v2  ;;  %1856 = vmatmul.msk.f32.vlgmr.msrb.gmra.mxu0 %vm497_vm3, %v438_v62  ;;  %v470_v3 = vrot.slane %v438_v62, 1  ;;  %v1350_v14 = vrot.slane %v438_v62, 7  ;;  %v1216_v16 = vrot.slane %v438_v62, 6 }
 0x118   :  { %v816_v20 = vrot.slane %v438_v62, 3  ;;  %v682_v22 = vrot.slane %v438_v62, 2  ;;  %v1082_v24 = vrot.slane %v438_v62, 5  ;;  %v949_v26 = vrot.slane %v438_v62, 4 }
 0x119   :  { %v372_v6 = vadd.f32 %v371_v48, %v271_v4  ;;  %v238_v62 = vadd.f32 %v2415_v47, %v2313_v11 }
 0x11b   :  { %v425_v12 = vmax.f32 %v372_v6, 0.0 }
 0x11d   :  { %v2431_v57 = vmax.f32 %v411_v8, %v425_v12  ;;  %v380_v30 = vpop.f32.mrf.mxu1 }
 0x11e   :  { %v273_v18 = vpop.f32.mrf.mxu0 }
 0x11f   :  { %v274_v61 = vadd.f32 %v2415_v47, %v273_v18  ;;  %v471_v7 = vrot.slane %v2431_v57, 1  ;;  %v1351_v28 = vrot.slane %v2431_v57, 7  ;;  %v1217_v32 = vrot.slane %v2431_v57, 6 }
 0x120   :  { %v817_v36 = vrot.slane %v2431_v57, 3  ;;  %v683_v38 = vrot.slane %v2431_v57, 2  ;;  %v1083_v40 = vrot.slane %v2431_v57, 5  ;;  %v950_v43 = vrot.slane %v2431_v57, 4 }
 0x121   :  { %v375_v44 = vadd.f32 %v374_v53, %v274_v61  ;;  %v472_v45 = vsel %vm469_vm4, %v470_v3, %v471_v7  ;;  %v1352_v48 = vsel %vm1349_vm5, %v1350_v14, %v1351_v28  ;;  %v2447_v49 = vsel %vm1215_vm6, %v1216_v16, %v1217_v32 }
 0x122   :  { %1841 = vmatmul.msk.f32.vlgmr.msrb.gmra.mxu1 %vm497_vm3, %v472_v45  ;;  %1952 = vmatmul.msk.f32.vlgmr.msra.gmra.mxu0 %vm497_vm3, %v1352_v48  ;;  %v2452_v50 = vsel %vm815_vm7, %v816_v20, %v817_v36  ;;  %v2455_v51 = vsel %vm681_vm8, %v682_v22, %v683_v38  ;;  %v2458_v52 = vsel %vm526_vm2, %v1082_v24, %v1083_v40  ;;  %v412_v53 = vmax.f32 %v333_v10, 0.0 }
 0x123   :  { %v426_v55 = vmax.f32 %v375_v44, 0.0  ;;  %1935 = vmatpush.msk.msrb.mxu1 %vm526_vm2, %v1934_v34  ;;  %v2462_v56 = vsel %vm204_vm0, %v949_v26, %v950_v43 }
 0x125   :  { %v440_v58 = vmax.f32 %v412_v53, %v426_v55  ;;  %v383_v6 = vpop.f32.mrf.mxu1 }
 0x126   :  { %v276_v0 = vpop.f32.mrf.mxu0 }
 0x127   :  { %v277_v2 = vadd.f32 %v2415_v47, %v276_v0  ;;  %1858 = vmatmul.msk.f32.vlgmr.msra.gmra.mxu3 %vm497_vm3, %v440_v58  ;;  %v473_v59 = vrot.slane %v440_v58, 1  ;;  %v1353_v4 = vrot.slane %v440_v58, 7  ;;  %v1219_v8 = vrot.slane %v440_v58, 6 }
 0x128   :  { %v819_v10 = vrot.slane %v440_v58, 3  ;;  %v685_v12 = vrot.slane %v440_v58, 2  ;;  %v1085_v3 = vrot.slane %v440_v58, 5  ;;  %v952_v14 = vrot.slane %v440_v58, 4 }
 0x129   :  { %v378_v16 = vadd.f32 %v377_v54, %v277_v2  ;;  %v474_v18 = vsel %vm469_vm4, %v471_v7, %v473_v59  ;;  %v1354_v1 = vsel %vm1349_vm5, %v1351_v28, %v1353_v4  ;;  %v2472_v11 = vsel %vm1215_vm6, %v1217_v32, %v1219_v8 }
 0x12a   :  { %1842 = vmatmul.msk.f32.gmra.mxu1 %vm497_vm3, %v474_v18  ;;  %1953 = vmatmul.msk.f32.gmra.mxu0 %vm497_vm3, %v1354_v1  ;;  %v2477_v63 = vsel %vm815_vm7, %v817_v36, %v819_v10  ;;  %v2480_v20 = vsel %vm681_vm8, %v683_v38, %v685_v12  ;;  %v2483_v22 = vsel %vm526_vm2, %v1083_v40, %v1085_v3  ;;  %v413_v54 = vmax.f32 %v336_v60, 0.0 }
 0x12b   :  { %v427_v24 = vmax.f32 %v378_v16, 0.0  ;;  %v2486_v26 = vsel %vm204_vm0, %v950_v43, %v952_v14  ;;  %v339_v7 = vadd.f32 %v2296_v5, %v238_v62  ;;  %v241_v2 = vadd.f32 %v2415_v47, %v2324_v15 }
 0x12d   :  { %v2488_v61 = vmax.f32 %v413_v54, %v427_v24  ;;  %v386_v40 = vpop.f32.mrf.mxu1  ;;  %v414_v0 = vmax.f32 %v339_v7, 0.0 }
 0x12e   :  { %v279_v28 = vpop.f32.mrf.mxu0 }
 0x12f   :  { %v280_v32 = vadd.f32 %v2415_v47, %v279_v28  ;;  %1859 = vmatmul.msk.f32.gmra.mxu3 %vm497_vm3, %v2488_v61  ;;  %v475_v34 = vrot.slane %v2488_v61, 1  ;;  %v1355_v36 = vrot.slane %v2488_v61, 7  ;;  %v1221_v38 = vrot.slane %v2488_v61, 6 }
 0x130   :  { %v821_v43 = vrot.slane %v2488_v61, 3  ;;  %v687_v44 = vrot.slane %v2488_v61, 2  ;;  %v1087_v45 = vrot.slane %v2488_v61, 5  ;;  %v954_v5 = vrot.slane %v2488_v61, 4 }
 0x131   :  { %v381_v48 = vadd.f32 %v380_v30, %v280_v32  ;;  %v476_v53 = vsel %vm469_vm4, %v473_v59, %v475_v34  ;;  %v1356_v55 = vsel %vm1349_vm5, %v1353_v4, %v1355_v36  ;;  %v2506_v58 = vsel %vm1215_vm6, %v1219_v8, %v1221_v38 }
 0x132   :  { %1843 = vmatmul.msk.f32.vlgmr.msra.gmra.mxu2 %vm497_vm3, %v476_v53  ;;  %1857 = vmatmul.msk.f32.vlgmr.msra.gmra.mxu1 %vm497_vm3, %v2431_v57  ;;  %v2512_v60 = vsel %vm815_vm7, %v819_v10, %v821_v43  ;;  %v2515_v62 = vsel %vm681_vm8, %v685_v12, %v687_v44  ;;  %v2518_v30 = vsel %vm526_vm2, %v1085_v3, %v1087_v45 }
 0x133   :  { %v428_v59 = vmax.f32 %v381_v48, 0.0  ;;  %1954 = vmatmul.msk.f32.gmra.mxu0 %vm497_vm3, %v1356_v55  ;;  %v2524_v4 = vsel %vm204_vm0, %v952_v14, %v954_v5  ;;  %v342_v10 = vadd.f32 %v2307_v9, %v241_v2  ;;  %v253_v61 = vadd.f32 %v2415_v47, %v2368_v31 }
 0x135   :  { %v2526_v57 = vmax.f32 %v414_v0, %v428_v59  ;;  %v389_v7 = vpop.f32.mrf.mxu1 }
 0x136   :  { %v282_v8 = vpop.f32.mrf.mxu0 }
 0x137   :  { %v283_v12 = vadd.f32 %v2415_v47, %v282_v8  ;;  %1860 = vmatmul.msk.f32.gmra.mxu3 %vm497_vm3, %v2526_v57  ;;  %v477_v3 = vrot.slane %v2526_v57, 1  ;;  %v1357_v15 = vrot.slane %v2526_v57, 7  ;;  %v823_v16 = vrot.slane %v2526_v57, 3 }
 0x138   :  { %v689_v18 = vrot.slane %v2526_v57, 2  ;;  %v1089_v14 = vrot.slane %v2526_v57, 5  ;;  %v956_v1 = vrot.slane %v2526_v57, 4 }
 0x139   :  { %v384_v54 = vadd.f32 %v383_v6, %v283_v12  ;;  %v478_v9 = vsel %vm469_vm4, %v475_v34, %v477_v3  ;;  %v1358_v24 = vsel %vm1349_vm5, %v1355_v36, %v1357_v15  ;;  %v2544_v28 = vsel %vm815_vm7, %v821_v43, %v823_v16 }
 0x13a   :  { %1844 = vmatmul.msk.f32.gmra.mxu2 %vm497_vm3, %v478_v9  ;;  %1936 = vmatmul.msk.f32.vlgmr.msrb.gmra.mxu1 %vm497_vm3, %v2447_v49  ;;  %v2547_v32 = vsel %vm681_vm8, %v687_v44, %v689_v18  ;;  %v2550_v48 = vsel %vm526_vm2, %v1087_v45, %v1089_v14  ;;  %v415_v6 = vmax.f32 %v342_v10, 0.0  ;;  %v244_v34 = vadd.f32 %v2415_v47, %v2335_v19 }
 0x13b   :  { %v429_v36 = vmax.f32 %v384_v54, 0.0  ;;  %1955 = vmatmul.msk.f32.gmra.mxu0 %vm497_vm3, %v1358_v24  ;;  %v2556_v53 = vsel %vm204_vm0, %v954_v5, %v956_v1 }
 0x13c   :  { %v345_v55 = vadd.f32 %v2318_v13, %v244_v34 }
 0x13d   :  { %v2558_v49 = vmax.f32 %v415_v6, %v429_v36 }
 0x13e   :  { %v285_v43 = vpop.f32.mrf.mxu0  ;;  %v416_v24 = vmax.f32 %v345_v55, 0.0 }
 0x13f   :  { %v286_v44 = vadd.f32 %v2415_v47, %v285_v43  ;;  %1861 = vmatmul.msk.f32.gmra.mxu3 %vm497_vm3, %v2558_v49  ;;  %v479_v45 = vrot.slane %v2558_v49, 1  ;;  %v1359_v19 = vrot.slane %v2558_v49, 7  ;;  %v825_v0 = vrot.slane %v2558_v49, 3 }
 0x140   :  { %v691_v2 = vrot.slane %v2558_v49, 2  ;;  %v1091_v5 = vrot.slane %v2558_v49, 5  ;;  %v958_v59 = vrot.slane %v2558_v49, 4 }
 0x141   :  { %v387_v8 = vadd.f32 %v386_v40, %v286_v44  ;;  %v480_v13 = vsel %vm469_vm4, %v477_v3, %v479_v45  ;;  %v1360_v10 = vsel %vm1349_vm5, %v1357_v15, %v1359_v19  ;;  %v2576_v12 = vsel %vm815_vm7, %v823_v16, %v825_v0 }
 0x142   :  { %1845 = vmatmul.msk.f32.gmra.mxu2 %vm497_vm3, %v480_v13  ;;  %1937 = vmatmul.msk.f32.gmra.mxu1 %vm497_vm3, %v2472_v11  ;;  %v2579_v54 = vsel %vm681_vm8, %v689_v18, %v691_v2  ;;  %v2582_v9 = vsel %vm526_vm2, %v1089_v14, %v1091_v5  ;;  %v247_v40 = vadd.f32 %v2415_v47, %v2346_v23  ;;  %v392_v11 = vpop.f32.mrf.mxu1 }
 0x143   :  { %v430_v3 = vmax.f32 %v387_v8, 0.0  ;;  %1956 = vmatmul.msk.f32.gmra.mxu0 %vm497_vm3, %v1360_v10  ;;  %v2588_v15 = vsel %vm204_vm0, %v956_v1, %v958_v59 }
 0x144   :  { %v348_v18 = vadd.f32 %v2329_v17, %v247_v40 }
 0x145   :  { %v2590_v6 = vmax.f32 %v416_v24, %v430_v3 }
 0x146   :  { %v288_v16 = vpop.f32.mrf.mxu0  ;;  %v417_v40 = vmax.f32 %v348_v18, 0.0 }
 0x147   :  { %v289_v34 = vadd.f32 %v2415_v47, %v288_v16  ;;  %1862 = vmatmul.msk.f32.gmra.mxu3 %vm497_vm3, %v2590_v6  ;;  %v481_v14 = vrot.slane %v2590_v6, 1  ;;  %v1361_v23 = vrot.slane %v2590_v6, 7  ;;  %v827_v36 = vrot.slane %v2590_v6, 3 }
 0x148   :  { %v693_v1 = vrot.slane %v2590_v6, 2  ;;  %v1093_v43 = vrot.slane %v2590_v6, 5  ;;  %v960_v55 = vrot.slane %v2590_v6, 4 }
 0x149   :  { %v390_v44 = vadd.f32 %v389_v7, %v289_v34  ;;  %v482_v17 = vsel %vm469_vm4, %v479_v45, %v481_v14  ;;  %v1362_v8 = vsel %vm1349_vm5, %v1359_v19, %v1361_v23  ;;  %v2608_v13 = vsel %vm815_vm7, %v825_v0, %v827_v36 }
 0x14a   :  { %1846 = vmatmul.msk.f32.gmra.mxu2 %vm497_vm3, %v482_v17  ;;  %1938 = vmatmul.msk.f32.gmra.mxu1 %vm497_vm3, %v2506_v58  ;;  %v2611_v10 = vsel %vm681_vm8, %v691_v2, %v693_v1  ;;  %v2614_v24 = vsel %vm526_vm2, %v1091_v5, %v1093_v43  ;;  %v250_v7 = vadd.f32 %v2415_v47, %v2357_v27  ;;  %v1223_v0 = vrot.slane %v2526_v57, 6  ;;  %v395_v2 = vpop.f32.mrf.mxu1 }
 0x14b   :  { %v431_v45 = vmax.f32 %v390_v44, 0.0  ;;  %1957 = vmatmul.msk.f32.gmra.mxu0 %vm497_vm3, %v1362_v8  ;;  %v2620_v19 = vsel %vm204_vm0, %v958_v59, %v960_v55 }
 0x14c   :  { %3327 = vst [vmem:[#allocation5_spill] sm:$0xff] %v2620_v19  ;;  %v351_v16 = vadd.f32 %v2340_v21, %v250_v7  ;;  %v1224_v8 = vsel %vm1215_vm6, %v1221_v38, %v1223_v0 }
 0x14d   :  { %v2622_v58 = vmax.f32 %v417_v40, %v431_v45 }
 0x14e   :  { %v291_v3 = vpop.f32.mrf.mxu0 }
 0x14f   :  { %v292_v5 = vadd.f32 %v2415_v47, %v291_v3  ;;  %1863 = vmatmul.msk.f32.gmra.mxu3 %vm497_vm3, %v2622_v58  ;;  %v483_v27 = vrot.slane %v2622_v58, 1  ;;  %v1363_v18 = vrot.slane %v2622_v58, 7  ;;  %v829_v59 = vrot.slane %v2622_v58, 3 }
 0x150   :  { %v695_v34 = vrot.slane %v2622_v58, 2  ;;  %v1095_v44 = vrot.slane %v2622_v58, 5  ;;  %v962_v57 = vrot.slane %v2622_v58, 4 }
 0x151   :  { %v393_v17 = vadd.f32 %v392_v11, %v292_v5  ;;  %v484_v21 = vsel %vm469_vm4, %v481_v14, %v483_v27  ;;  %v1364_v40 = vsel %vm1349_vm5, %v1361_v23, %v1363_v18  ;;  %v2643_v7 = vsel %vm815_vm7, %v827_v36, %v829_v59 }
 0x152   :  { %1847 = vmatmul.msk.f32.gmra.mxu2 %vm497_vm3, %v484_v21  ;;  %1939 = vmatmul.msk.f32.gmra.mxu1 %vm497_vm3, %v1224_v8  ;;  %v2646_v45 = vsel %vm681_vm8, %v693_v1, %v695_v34  ;;  %v2649_v11 = vsel %vm526_vm2, %v1093_v43, %v1095_v44  ;;  %v418_v14 = vmax.f32 %v351_v16, 0.0  ;;  %v2655_v23 = vsel %vm204_vm0, %v960_v55, %v962_v57 }
 0x153   :  { %v432_v38 = vmax.f32 %v393_v17, 0.0  ;;  %1958 = vmatmul.msk.f32.gmra.mxu0 %vm497_vm3, %v1364_v40  ;;  %3328 = vst [vmem:[#allocation6_spill] sm:$0xff] %v2655_v23  ;;  %v1225_v36 = vrot.slane %v2558_v49, 6  ;;  %v354_v1 = vadd.f32 %v2351_v25, %v253_v61  ;;  %v398_v17 = vpop.f32.mrf.mxu1 }
 0x155   :  { %v2657_v3 = vmax.f32 %v418_v14, %v432_v38  ;;  %v1226_v14 = vsel %vm1215_vm6, %v1223_v0, %v1225_v36 }
 0x156   :  { %v294_v5 = vpop.f32.mrf.mxu0 }
 0x157   :  { %v295_v43 = vadd.f32 %v2415_v47, %v294_v5  ;;  %1864 = vmatmul.msk.f32.gmra.mxu3 %vm497_vm3, %v2657_v3  ;;  %v485_v31 = vrot.slane %v2657_v3, 1  ;;  %v1365_v16 = vrot.slane %v2657_v3, 7  ;;  %v831_v55 = vrot.slane %v2657_v3, 3 }
 0x158   :  { %v697_v21 = vrot.slane %v2657_v3, 2  ;;  %v1097_v8 = vrot.slane %v2657_v3, 5  ;;  %v964_v49 = vrot.slane %v2657_v3, 4 }
 0x159   :  { %v396_v40 = vadd.f32 %v395_v2, %v295_v43  ;;  %v486_v25 = vsel %vm469_vm4, %v483_v27, %v485_v31  ;;  %v1366_v61 = vsel %vm1349_vm5, %v1363_v18, %v1365_v16  ;;  %v2676_v38 = vsel %vm815_vm7, %v829_v59, %v831_v55 }
 0x15a   :  { %1848 = vmatmul.msk.f32.gmra.mxu2 %vm497_vm3, %v486_v25  ;;  %1940 = vmatmul.msk.f32.gmra.mxu1 %vm497_vm3, %v1226_v14  ;;  %v2679_v5 = vsel %vm681_vm8, %v695_v34, %v697_v21  ;;  %v2682_v23 = vsel %vm526_vm2, %v1095_v44, %v1097_v8  ;;  %v419_v2 = vmax.f32 %v354_v1, 0.0  ;;  %v256_v27 = vadd.f32 %v2415_v47, %v2379_v35 }
 0x15b   :  { %3329 = vst [vmem:[#allocation7_spill] sm:$0xff] %v2682_v23  ;;  %v433_v0 = vmax.f32 %v396_v40, 0.0  ;;  %1959 = vmatmul.msk.f32.gmra.mxu0 %vm497_vm3, %v1366_v61  ;;  %v2688_v18 = vsel %vm204_vm0, %v962_v57, %v964_v49  ;;  %v1227_v59 = vrot.slane %v2590_v6, 6 }
 0x15c   :  { %3330 = vst [vmem:[#allocation8_spill] sm:$0xff] %v2688_v18  ;;  %v357_v34 = vadd.f32 %v2362_v29, %v256_v27 }
 0x15d   :  { %v2690_v43 = vmax.f32 %v419_v2, %v433_v0  ;;  %v1228_v2 = vsel %vm1215_vm6, %v1225_v36, %v1227_v59  ;;  %v401_v0 = vpop.f32.mrf.mxu1  ;;  %v259_v36 = vadd.f32 %v2415_v47, %v2389_v39 }
 0x15e   :  { %v297_v25 = vpop.f32.mrf.mxu0 }
 0x15f   :  { %v298_v44 = vadd.f32 %v2415_v47, %v297_v25  ;;  %1865 = vmatmul.msk.f32.gmra.mxu3 %vm497_vm3, %v2690_v43  ;;  %v487_v35 = vrot.slane %v2690_v43, 1  ;;  %v1367_v1 = vrot.slane %v2690_v43, 7  ;;  %v833_v40 = vrot.slane %v2690_v43, 3 }
 0x160   :  { %v699_v57 = vrot.slane %v2690_v43, 2  ;;  %v1099_v14 = vrot.slane %v2690_v43, 5  ;;  %v966_v6 = vrot.slane %v2690_v43, 4 }
 0x161   :  { %v399_v61 = vadd.f32 %v398_v17, %v298_v44  ;;  %v488_v29 = vsel %vm469_vm4, %v485_v31, %v487_v35  ;;  %v1368_v27 = vsel %vm1349_vm5, %v1365_v16, %v1367_v1  ;;  %v2709_v25 = vsel %vm815_vm7, %v831_v55, %v833_v40  ;;  %v1886_v16 = vld [vmem:[%s3319_s3 + $0xc] sm:$0x7] }
 0x162   :  { %1849 = vmatmul.msk.f32.gmra.mxu2 %vm497_vm3, %v488_v29  ;;  %1941 = vmatmul.msk.f32.gmra.mxu1 %vm497_vm3, %v1228_v2  ;;  %v2712_v18 = vsel %vm681_vm8, %v697_v21, %v699_v57  ;;  %v2715_v23 = vsel %vm526_vm2, %v1097_v8, %v1099_v14  ;;  %v420_v17 = vmax.f32 %v357_v34, 0.0  ;;  %v2724_v55 = vsel %vm204_vm0, %v964_v49, %v966_v6 }
 0x163   :  { %3331 = vst [vmem:[#allocation9_spill] sm:$0xff] %v2715_v23  ;;  %v434_v31 = vmax.f32 %v399_v61, 0.0  ;;  %1960 = vmatmul.msk.f32.gmra.mxu0 %vm497_vm3, %v1368_v27  ;;  %1887 = vmatpush.msk.msrb.mxu3 %vm526_vm2, %v1886_v16  ;;  %v1229_v8 = vrot.slane %v2622_v58, 6  ;;  %v360_v44 = vadd.f32 %v2373_v33, %v259_v36 }
 0x164   :  { %3332 = vst [vmem:[#allocation10_spill] sm:$0xff] %v2724_v55 }
 0x165   :  { %v2727_v21 = vmax.f32 %v420_v17, %v434_v31  ;;  %v1230_v36 = vsel %vm1215_vm6, %v1227_v59, %v1229_v8 }
 0x166   :  { %v300_v34 = vpop.f32.mrf.mxu0 }
 0x167   :  { %v301_v39 = vadd.f32 %v2415_v47, %v300_v34  ;;  %1866 = vmatmul.msk.f32.gmra.mxu3 %vm497_vm3, %v2727_v21  ;;  %v489_v61 = vrot.slane %v2727_v21, 1  ;;  %v1369_v29 = vrot.slane %v2727_v21, 7  ;;  %v835_v49 = vrot.slane %v2727_v21, 3 }
 0x168   :  { %v701_v2 = vrot.slane %v2727_v21, 2  ;;  %v1101_v27 = vrot.slane %v2727_v21, 5  ;;  %v968_v58 = vrot.slane %v2727_v21, 4 }
 0x169   :  { %v402_v17 = vadd.f32 %v401_v0, %v301_v39  ;;  %v490_v33 = vsel %vm469_vm4, %v487_v35, %v489_v61  ;;  %v1370_v31 = vsel %vm1349_vm5, %v1367_v1, %v1369_v29  ;;  %v2746_v16 = vsel %vm815_vm7, %v833_v40, %v835_v49  ;;  %v404_v39 = vpop.f32.mrf.mxu1 }
 0x16a   :  { %1850 = vmatmul.msk.f32.gmra.mxu2 %vm497_vm3, %v490_v33  ;;  %1942 = vmatmul.msk.f32.gmra.mxu1 %vm497_vm3, %v1230_v36  ;;  %v2749_v34 = vsel %vm681_vm8, %v699_v57, %v701_v2  ;;  %v2752_v55 = vsel %vm526_vm2, %v1099_v14, %v1101_v27  ;;  %v421_v0 = vmax.f32 %v360_v44, 0.0  ;;  %v262_v35 = vadd.f32 %v2415_v47, %v2398_v42 }
 0x16b   :  { %3333 = vst [vmem:[#allocation11_spill] sm:$0xff] %v2752_v55  ;;  %v435_v59 = vmax.f32 %v402_v17, 0.0  ;;  %1961 = vmatmul.msk.f32.gmra.mxu0 %vm497_vm3, %v1370_v31  ;;  %v2758_v1 = vsel %vm204_vm0, %v966_v6, %v968_v58  ;;  %v1231_v40 = vrot.slane %v2657_v3, 6  ;;  %v1870_v6 = vld [vmem:[%s3319_s3 + $0x8] sm:$0x7] }
 0x16c   :  { %3334 = vst [vmem:[#allocation12_spill] sm:$0xff] %v2758_v1  ;;  %v363_v36 = vadd.f32 %v2384_v37, %v262_v35  ;;  %1871 = vmatpush.msk.msrb.mxu2 %vm526_vm2, %v1870_v6 }
 0x16d   :  { %v2760_v33 = vmax.f32 %v421_v0, %v435_v59  ;;  %v1232_v59 = vsel %vm1215_vm6, %v1229_v8, %v1231_v40 }
 0x16e   :  { %v303_v57 = vpop.f32.mrf.mxu0 }
 0x16f   :  { %v304_v14 = vadd.f32 %v2415_v47, %v303_v57  ;;  %1867 = vmatmul.msk.f32.gmra.mxu3 %vm497_vm3, %v2760_v33  ;;  %v491_v42 = vrot.slane %v2760_v33, 1  ;;  %v1371_v44 = vrot.slane %v2760_v33, 7  ;;  %v837_v3 = vrot.slane %v2760_v33, 3 }
 0x170   :  { %v703_v17 = vrot.slane %v2760_v33, 2  ;;  %v1103_v37 = vrot.slane %v2760_v33, 5  ;;  %v970_v31 = vrot.slane %v2760_v33, 4 }
 0x171   :  { %v405_v0 = vadd.f32 %v404_v39, %v304_v14  ;;  %v492_v35 = vsel %vm469_vm4, %v489_v61, %v491_v42  ;;  %v1372_v57 = vsel %vm1349_vm5, %v1369_v29, %v1371_v44  ;;  %v2783_v6 = vsel %vm815_vm7, %v835_v49, %v837_v3 }
 0x172   :  { %1851 = vmatmul.msk.f32.gmra.mxu2 %vm497_vm3, %v492_v35  ;;  %1943 = vmatmul.msk.f32.gmra.mxu1 %vm497_vm3, %v1232_v59  ;;  %v2786_v1 = vsel %vm681_vm8, %v701_v2, %v703_v17  ;;  %v2789_v55 = vsel %vm526_vm2, %v1101_v27, %v1103_v37  ;;  %v422_v39 = vmax.f32 %v363_v36, 0.0  ;;  %v265_v61 = vadd.f32 %v2415_v47, %v2410_v46  ;;  %v407_v59 = vpop.f32.mrf.mxu1 }
 0x173   :  { %3335 = vst [vmem:[#allocation13_spill] sm:$0xff] %v2789_v55  ;;  %v436_v8 = vmax.f32 %v405_v0, 0.0  ;;  %1962 = vmatmul.msk.f32.gmra.mxu0 %vm497_vm3, %v1372_v57  ;;  %v2795_v29 = vsel %vm204_vm0, %v968_v58, %v970_v31  ;;  %v1233_v49 = vrot.slane %v2690_v43, 6 }
 0x174   :  { %v366_v2 = vadd.f32 %v2396_v41, %v265_v61 }
 0x175   :  { %v450_v14 = vmax.f32 %v422_v39, %v436_v8  ;;  %v1234_v39 = vsel %vm1215_vm6, %v1231_v40, %v1233_v49 }
 0x176   :  { %v306_v35 = vpop.f32.mrf.mxu0  ;;  %v423_v8 = vmax.f32 %v366_v2, 0.0 }
 0x177   :  { %v307_v27 = vadd.f32 %v2415_v47, %v306_v35  ;;  %1868 = vmatmul.msk.f32.gmra.mxu3 %vm497_vm3, %v450_v14  ;;  %v493_v36 = vrot.slane %v450_v14, 1  ;;  %v1373_v55 = vrot.slane %v450_v14, 7  ;;  %v839_v46 = vrot.slane %v450_v14, 3 }
 0x178   :  { %v705_v0 = vrot.slane %v450_v14, 2  ;;  %v1105_v23 = vrot.slane %v450_v14, 5  ;;  %v972_v57 = vrot.slane %v450_v14, 4 }
 0x179   :  { %v408_v19 = vadd.f32 %v407_v59, %v307_v27  ;;  %v494_v58 = vsel %vm469_vm4, %v491_v42, %v493_v36  ;;  %v1374_v43 = vsel %vm1349_vm5, %v1371_v44, %v1373_v55  ;;  %v2807_v41 = vsel %vm815_vm7, %v837_v3, %v839_v46 }
 0x17a   :  { %1852 = vmatmul.msk.f32.gmra.mxu2 %vm497_vm3, %v494_v58  ;;  %1944 = vmatmul.msk.f32.gmra.mxu1 %vm497_vm3, %v1234_v39  ;;  %v2810_v47 = vsel %vm681_vm8, %v703_v17, %v705_v0  ;;  %v2813_v61 = vsel %vm526_vm2, %v1103_v37, %v1105_v23  ;;  %v2817_v40 = vsel %vm204_vm0, %v970_v31, %v972_v57  ;;  %v1235_v44 = vrot.slane %v2727_v21, 6 }
 0x17b   :  { %v437_v35 = vmax.f32 %v408_v19, 0.0  ;;  %1963 = vmatmul.msk.f32.gmra.mxu0 %vm497_vm3, %v1374_v43 }
 0x17c   :  { %v1236_v27 = vsel %vm1215_vm6, %v1233_v49, %v1235_v44 }
 0x17d   :  { %v2819_v42 = vmax.f32 %v423_v8, %v437_v35 }
 0x17f   :  { %1869 = vmatmul.msk.f32.gmra.mxu3 %vm497_vm3, %v2819_v42  ;;  %v495_v3 = vrot.slane %v2819_v42, 1  ;;  %v1375_v17 = vrot.slane %v2819_v42, 7  ;;  %v841_v37 = vrot.slane %v2819_v42, 3  ;;  %v707_v19 = vrot.slane %v2819_v42, 2 }
 0x180   :  { %v1107_v59 = vrot.slane %v2819_v42, 5  ;;  %v974_v31 = vrot.slane %v2819_v42, 4 }
 0x181   :  { %v496_v2 = vsel %vm469_vm4, %v493_v36, %v495_v3  ;;  %v1376_v21 = vsel %vm1349_vm5, %v1373_v55, %v1375_v17  ;;  %v2836_v58 = vsel %vm815_vm7, %v839_v46, %v841_v37  ;;  %v2843_v39 = vsel %vm681_vm8, %v705_v0, %v707_v19 }
 0x182   :  { %1853 = vmatmul.msk.f32.gmra.mxu2 %vm497_vm3, %v496_v2  ;;  %1945 = vmatmul.msk.f32.gmra.mxu1 %vm497_vm3, %v1236_v27  ;;  %v2848_v49 = vsel %vm526_vm2, %v1105_v23, %v1107_v59  ;;  %v2853_v55 = vsel %vm204_vm0, %v972_v57, %v974_v31  ;;  %v1237_v36 = vrot.slane %v2760_v33, 6  ;;  %v1239_v23 = vrot.slane %v450_v14, 6 }
 0x183   :  { %1964 = vmatmul.msk.f32.gmra.mxu0 %vm497_vm3, %v1376_v21 }
 0x184   :  { %v1238_v46 = vsel %vm1215_vm6, %v1235_v44, %v1237_v36  ;;  %v1240_v0 = vsel %vm1215_vm6, %v1237_v36, %v1239_v23 }
 0x187   :  { %1888 = vmatmul.msk.f32.vlgmr.msrb.gmra.mxu3 %vm497_vm3, %v2452_v50  ;;  %v1241_v50 = vrot.slane %v2819_v42, 6 }
 0x189   :  { %v1242_v33 = vsel %vm1215_vm6, %v1239_v23, %v1241_v50 }
 0x18a   :  { %1854 = vmatmul.msk.f32.gmra.mxu2 %vm497_vm3, %v495_v3  ;;  %1946 = vmatmul.msk.f32.gmra.mxu1 %vm497_vm3, %v1238_v46 }
 0x18b   :  { %1965 = vmatmul.msk.f32.gmra.mxu0 %vm497_vm3, %v1375_v17 }
 0x18f   :  { %1889 = vmatmul.msk.f32.gmra.mxu3 %vm497_vm3, %v2477_v63 }
 0x192   :  { %1872 = vmatmul.msk.f32.vlgmr.msrb.gmra.mxu2 %vm497_vm3, %v2455_v51  ;;  %1947 = vmatmul.msk.f32.gmra.mxu1 %vm497_vm3, %v1240_v0 }
 0x197   :  { %1890 = vmatmul.msk.f32.gmra.mxu3 %vm497_vm3, %v2512_v60 }
 0x19a   :  { %1873 = vmatmul.msk.f32.gmra.mxu2 %vm497_vm3, %v2480_v20  ;;  %1948 = vmatmul.msk.f32.gmra.mxu1 %vm497_vm3, %v1242_v33 }
 0x19f   :  { %1891 = vmatmul.msk.f32.gmra.mxu3 %vm497_vm3, %v2544_v28  ;;  %v547_v21 = vpop.f32.mrf.mxu1 }
 0x1a2   :  { %1874 = vmatmul.msk.f32.gmra.mxu2 %vm497_vm3, %v2515_v62  ;;  %1949 = vmatmul.msk.f32.gmra.mxu1 %vm497_vm3, %v1241_v50 }
 0x1a7   :  { %1892 = vmatmul.msk.f32.gmra.mxu3 %vm497_vm3, %v2576_v12  ;;  %v550_v46 = vpop.f32.mrf.mxu1 }
 0x1aa   :  { %v643_v51 = vpop.f32.mrf.mxu3  ;;  %1875 = vmatmul.msk.f32.gmra.mxu2 %vm497_vm3, %v2547_v32 }
 0x1af   :  { %1893 = vmatmul.msk.f32.gmra.mxu3 %vm497_vm3, %v2608_v13 }
 0x1b2   :  { %v646_v63 = vpop.f32.mrf.mxu3  ;;  %1876 = vmatmul.msk.f32.gmra.mxu2 %vm497_vm3, %v2579_v54 }
 0x1b5   :  { %v553_v20 = vpop.f32.mrf.mxu2 }
 0x1b6   :  { %v2889_v60 = vadd.f32 %v643_v51, %v553_v20 }
 0x1b7   :  { %1894 = vmatmul.msk.f32.gmra.mxu3 %vm497_vm3, %v2643_v7 }
 0x1ba   :  { %v649_v62 = vpop.f32.mrf.mxu3  ;;  %1877 = vmatmul.msk.f32.gmra.mxu2 %vm497_vm3, %v2611_v10 }
 0x1bd   :  { %v556_v28 = vpop.f32.mrf.mxu2 }
 0x1be   :  { %v2895_v12 = vadd.f32 %v646_v63, %v556_v28 }
 0x1bf   :  { %1895 = vmatmul.msk.f32.gmra.mxu3 %vm497_vm3, %v2676_v38 }
 0x1c2   :  { %v652_v32 = vpop.f32.mrf.mxu3  ;;  %1878 = vmatmul.msk.f32.gmra.mxu2 %vm497_vm3, %v2646_v45 }
 0x1c5   :  { %v559_v54 = vpop.f32.mrf.mxu2 }
 0x1c6   :  { %v2901_v13 = vadd.f32 %v649_v62, %v559_v54 }
 0x1c7   :  { %1896 = vmatmul.msk.f32.gmra.mxu3 %vm497_vm3, %v2709_v25  ;;  %v1902_v25 = vld [vmem:[%s3319_s3 + $0x10] sm:$0x7] }
 0x1c8   :  { %1903 = vmatpush.msk.msra.mxu2 %vm526_vm2, %v1902_v25  ;;  %v3341_v25 = vld [vmem:[#allocation8_spill] sm:$0xff] }
 0x1ca   :  { %v655_v7 = vpop.f32.mrf.mxu3  ;;  %1879 = vmatmul.msk.f32.gmra.mxu2 %vm497_vm3, %v2679_v5  ;;  %v1918_v5 = vld [vmem:[%s3319_s3 + $0x14] sm:$0x7]  ;;  %s2018_s3 = smov 122  }
 0x1cb   :  { %1919 = vmatpush.msk.msra.mxu3 %vm526_vm2, %v1918_v5  ;;  %v3342_v5 = vld [vmem:[#allocation11_spill] sm:$0xff] }
 0x1cd   :  { %v562_v10 = vpop.f32.mrf.mxu2 }
 0x1ce   :  { %v2907_v14 = vadd.f32 %v652_v32, %v562_v10  ;;  %v3336_v32 = vld [vmem:[#allocation5_spill] sm:$0xff] }
 0x1cf   :  { %1897 = vmatmul.msk.f32.gmra.mxu3 %vm497_vm3, %v2746_v16 }
 0x1d2   :  { %v658_v38 = vpop.f32.mrf.mxu3  ;;  %1880 = vmatmul.msk.f32.gmra.mxu2 %vm497_vm3, %v2712_v18 }
 0x1d5   :  { %v565_v45 = vpop.f32.mrf.mxu2 }
 0x1d6   :  { %v2913_v57 = vadd.f32 %v655_v7, %v565_v45  ;;  %v3337_v7 = vld [vmem:[#allocation7_spill] sm:$0xff] }
 0x1d7   :  { %1898 = vmatmul.msk.f32.gmra.mxu3 %vm497_vm3, %v2783_v6 }
 0x1da   :  { %v661_v16 = vpop.f32.mrf.mxu3  ;;  %1881 = vmatmul.msk.f32.gmra.mxu2 %vm497_vm3, %v2749_v34 }
 0x1dd   :  { %v568_v18 = vpop.f32.mrf.mxu2 }
 0x1de   :  { %v2927_v43 = vadd.f32 %v658_v38, %v568_v18  ;;  %v3339_v38 = vld [vmem:[#allocation9_spill] sm:$0xff]  ;;  %v3343_v18 = vld [vmem:[#allocation10_spill] sm:$0xff] }
 0x1df   :  { %1899 = vmatmul.msk.f32.gmra.mxu3 %vm497_vm3, %v2807_v41 }
 0x1e2   :  { %v664_v8 = vpop.f32.mrf.mxu3  ;;  %1882 = vmatmul.msk.f32.gmra.mxu2 %vm497_vm3, %v2786_v1 }
 0x1e5   :  { %v571_v35 = vpop.f32.mrf.mxu2 }
 0x1e6   :  { %v2933_v6 = vadd.f32 %v661_v16, %v571_v35  ;;  %v3344_v35 = vld [vmem:[#allocation13_spill] sm:$0xff] }
 0x1e7   :  { %1900 = vmatmul.msk.f32.gmra.mxu3 %vm497_vm3, %v2836_v58 }
 0x1ea   :  { %v667_v44 = vpop.f32.mrf.mxu3  ;;  %1883 = vmatmul.msk.f32.gmra.mxu2 %vm497_vm3, %v2810_v47 }
 0x1ed   :  { %v574_v34 = vpop.f32.mrf.mxu2 }
 0x1ee   :  { %v2939_v3 = vadd.f32 %v664_v8, %v574_v34  ;;  %v3345_v34 = vld [vmem:[#allocation12_spill] sm:$0xff] }
 0x1ef   :  { %1901 = vmatmul.msk.f32.gmra.mxu3 %vm497_vm3, %v841_v37 }
 0x1f2   :  { %v670_v41 = vpop.f32.mrf.mxu3  ;;  %1884 = vmatmul.msk.f32.gmra.mxu2 %vm497_vm3, %v2843_v39 }
 0x1f5   :  { %v577_v1 = vpop.f32.mrf.mxu2 }
 0x1f6   :  { %v2946_v17 = vadd.f32 %v667_v44, %v577_v1 }
 0x1f7   :  { %1920 = vmatmul.msk.f32.vlgmr.msra.gmra.mxu3 %vm497_vm3, %v2458_v52 }
 0x1fa   :  { %v673_v2 = vpop.f32.mrf.mxu3  ;;  %1885 = vmatmul.msk.f32.gmra.mxu2 %vm497_vm3, %v707_v19 }
 0x1fd   :  { %v580_v47 = vpop.f32.mrf.mxu2 }
 0x1fe   :  { %v2953_v27 = vadd.f32 %v670_v41, %v580_v47 }
 0x1ff   :  { %1921 = vmatmul.msk.f32.gmra.mxu3 %vm497_vm3, %v2483_v22 }
 0x202   :  { %v676_v37 = vpop.f32.mrf.mxu3  ;;  %1904 = vmatmul.msk.f32.vlgmr.msra.gmra.mxu2 %vm497_vm3, %v2462_v56  ;;  %v637_v56 = vpop.f32.mrf.mxu0 }
 0x203   :  { %v638_v23 = vadd.f32 %v637_v56, %v547_v21 }
 0x205   :  { %v583_v58 = vpop.f32.mrf.mxu2 }
 0x206   :  { %v2959_v39 = vadd.f32 %v673_v2, %v583_v58 }
 0x207   :  { %1922 = vmatmul.msk.f32.gmra.mxu3 %vm497_vm3, %v2518_v30 }
 0x20a   :  { %v891_v52 = vpop.f32.mrf.mxu3  ;;  %1905 = vmatmul.msk.f32.gmra.mxu2 %vm497_vm3, %v2486_v26  ;;  %v640_v26 = vpop.f32.mrf.mxu1 }
 0x20b   :  { %v641_v51 = vadd.f32 %v640_v26, %v550_v46 }
 0x20d   :  { %v586_v19 = vpop.f32.mrf.mxu2 }
 0x20e   :  { %v2965_v36 = vadd.f32 %v676_v37, %v586_v19  ;;  %v3052_v19 = vpop.f32.mrf.mxu0 }
 0x20f   :  { %1923 = vmatmul.msk.f32.gmra.mxu3 %vm497_vm3, %v2550_v48 }
 0x212   :  { %v894_v22 = vpop.f32.mrf.mxu3  ;;  %1906 = vmatmul.msk.f32.gmra.mxu2 %vm497_vm3, %v2524_v4  ;;  %v1291_v58 = vpop.f32.mrf.mxu1 }
 0x215   :  { %v757_v0 = vpop.f32.mrf.mxu2 }
 0x216   :  { %v799_v50 = vadd.f32 %v757_v0, %v638_v23  ;;  %v1428_v0 = vpop.f32.mrf.mxu0 }
 0x217   :  { %1924 = vmatmul.msk.f32.gmra.mxu3 %vm497_vm3, %v2582_v9 }
 0x218   :  { %v2973_v30 = vadd.f32 %v891_v52, %v799_v50 }
 0x21a   :  { %v897_v33 = vpop.f32.mrf.mxu3  ;;  %1907 = vmatmul.msk.f32.gmra.mxu2 %vm497_vm3, %v2556_v53  ;;  %v1294_v56 = vpop.f32.mrf.mxu1 }
 0x21d   :  { %v760_v48 = vpop.f32.mrf.mxu2 }
 0x21e   :  { %v800_v63 = vadd.f32 %v760_v48, %v641_v51 }
 0x21f   :  { %1925 = vmatmul.msk.f32.gmra.mxu3 %vm497_vm3, %v2614_v24 }
 0x220   :  { %v2979_v4 = vadd.f32 %v894_v22, %v800_v63 }
 0x222   :  { %v900_v20 = vpop.f32.mrf.mxu3  ;;  %1908 = vmatmul.msk.f32.gmra.mxu2 %vm497_vm3, %v2588_v15  ;;  %v1297_v26 = vpop.f32.mrf.mxu1 }
 0x225   :  { %v763_v9 = vpop.f32.mrf.mxu2 }
 0x226   :  { %v801_v62 = vadd.f32 %v763_v9, %v2889_v60  ;;  %v3338_v60 = vld [vmem:[#allocation6_spill] sm:$0xff] }
 0x227   :  { %1926 = vmatmul.msk.f32.gmra.mxu3 %vm497_vm3, %v2649_v11 }
 0x228   :  { %v2986_v28 = vadd.f32 %v897_v33, %v801_v62  ;;  %v3060_v33 = vpop.f32.mrf.mxu0 }
 0x22a   :  { %v2988_v53 = vpop.f32.mrf.mxu3  ;;  %1909 = vmatmul.msk.f32.gmra.mxu2 %vm497_vm3, %v3336_v32  ;;  %v3062_v63 = vpop.f32.mrf.mxu1 }
 0x22d   :  { %v766_v24 = vpop.f32.mrf.mxu2 }
 0x22e   :  { %v802_v54 = vadd.f32 %v766_v24, %v2895_v12 }
 0x22f   :  { %1927 = vmatmul.msk.f32.gmra.mxu3 %vm497_vm3, %v3337_v7 }
 0x230   :  { %v2995_v15 = vadd.f32 %v900_v20, %v802_v54 }
 0x232   :  { %v2997_v10 = vpop.f32.mrf.mxu3  ;;  %1910 = vmatmul.msk.f32.gmra.mxu2 %vm497_vm3, %v3338_v60  ;;  %v3066_v32 = vpop.f32.mrf.mxu1 }
 0x235   :  { %v3001_v11 = vpop.f32.mrf.mxu2 }
 0x237   :  { %1928 = vmatmul.msk.f32.gmra.mxu3 %vm497_vm3, %v3339_v38 }
 0x23a   :  { %v3005_v45 = vpop.f32.mrf.mxu3  ;;  %1911 = vmatmul.msk.f32.gmra.mxu2 %vm497_vm3, %v3341_v25  ;;  %v3070_v7 = vpop.f32.mrf.mxu1 }
 0x23b   :  { %3340 = vst [vmem:[#allocation5_spill] sm:$0xff] %v3005_v45 }
 0x23c   :  { %3349 = vst [vmem:[#allocation8_spill] sm:$0xff] %v3070_v7 }
 0x23d   :  { %v3009_v12 = vpop.f32.mrf.mxu2 }
 0x23f   :  { %1929 = vmatmul.msk.f32.gmra.mxu3 %vm497_vm3, %v3342_v5 }
 0x242   :  { %v3013_v16 = vpop.f32.mrf.mxu3  ;;  %1912 = vmatmul.msk.f32.gmra.mxu2 %vm497_vm3, %v3343_v18  ;;  %v3078_v18 = vpop.f32.mrf.mxu1 }
 0x243   :  { %3352 = vst [vmem:[#allocation13_spill] sm:$0xff] %v3078_v18 }
 0x245   :  { %v3017_v8 = vpop.f32.mrf.mxu2 }
 0x247   :  { %1930 = vmatmul.msk.f32.gmra.mxu3 %vm497_vm3, %v3344_v35 }
 0x24a   :  { %v3021_v44 = vpop.f32.mrf.mxu3  ;;  %1913 = vmatmul.msk.f32.gmra.mxu2 %vm497_vm3, %v3345_v34 }
 0x24d   :  { %v778_v41 = vpop.f32.mrf.mxu2 }
 0x24f   :  { %1931 = vmatmul.msk.f32.gmra.mxu3 %vm497_vm3, %v2813_v61 }
 0x252   :  { %v3027_v1 = vpop.f32.mrf.mxu3  ;;  %1914 = vmatmul.msk.f32.gmra.mxu2 %vm497_vm3, %v2795_v29 }
 0x255   :  { %v781_v2 = vpop.f32.mrf.mxu2 }
 0x257   :  { %1932 = vmatmul.msk.f32.gmra.mxu3 %vm497_vm3, %v2848_v49 }
 0x25a   :  { %v3033_v47 = vpop.f32.mrf.mxu3  ;;  %1915 = vmatmul.msk.f32.gmra.mxu2 %vm497_vm3, %v2817_v40 }
 0x25d   :  { %v3037_v37 = vpop.f32.mrf.mxu2 }
 0x25f   :  { %1933 = vmatmul.msk.f32.gmra.mxu3 %vm497_vm3, %v1107_v59 }
 0x262   :  { %v924_v61 = vpop.f32.mrf.mxu3  ;;  %1916 = vmatmul.msk.f32.gmra.mxu2 %vm497_vm3, %v2853_v55 }
 0x265   :  { %v3044_v29 = vpop.f32.mrf.mxu2 }
 0x26a   :  { %v927_v21 = vpop.f32.mrf.mxu3  ;;  %1917 = vmatmul.msk.f32.gmra.mxu2 %vm497_vm3, %v974_v31 }
 0x26d   :  { %v790_v49 = vpop.f32.mrf.mxu2 }
 0x26e   :  { %v810_v40 = vadd.f32 %v790_v49, %v2953_v27 }
 0x270   :  { %v3050_v52 = vadd.f32 %v924_v61, %v810_v40 }
 0x272   :  { %3346 = vst [vmem:[#allocation7_spill] sm:$0xff] %v3050_v52  ;;  %v930_v59 = vpop.f32.mrf.mxu3 }
 0x275   :  { %v793_v46 = vpop.f32.mrf.mxu2 }
 0x276   :  { %v811_v22 = vadd.f32 %v793_v46, %v2959_v39  ;;  %v3064_v39 = vpop.f32.mrf.mxu0 }
 0x278   :  { %v3055_v55 = vadd.f32 %v927_v21, %v811_v22  ;;  %v1312_v21 = vpop.f32.mrf.mxu1 }
 0x27a   :  { %3347 = vst [vmem:[#allocation6_spill] sm:$0xff] %v3055_v55  ;;  %v1157_v23 = vpop.f32.mrf.mxu3 }
 0x27d   :  { %v796_v42 = vpop.f32.mrf.mxu2 }
 0x27e   :  { %v812_v31 = vadd.f32 %v796_v42, %v2965_v36  ;;  %v3068_v24 = vpop.f32.mrf.mxu0 }
 0x280   :  { %v3058_v50 = vadd.f32 %v930_v59, %v812_v31  ;;  %v806_v59 = vadd.f32 %v778_v41, %v2927_v43  ;;  %v1315_v52 = vpop.f32.mrf.mxu1 }
 0x282   :  { %3348 = vst [vmem:[#allocation9_spill] sm:$0xff] %v3058_v50  ;;  %v1160_v27 = vpop.f32.mrf.mxu3  ;;  %v940_v42 = vadd.f32 %v3013_v16, %v806_v59  ;;  %v3357_v59 = vld [vmem:[#allocation8_spill] sm:$0xff] }
 0x285   :  { %v1024_v51 = vpop.f32.mrf.mxu2 }
 0x286   :  { %v3074_v38 = vpop.f32.mrf.mxu0  ;;  %v1066_v22 = vadd.f32 %v1024_v51, %v2973_v30 }
 0x287   :  { %3350 = vst [vmem:[#allocation11_spill] sm:$0xff] %v3074_v38  ;;  %v807_v38 = vadd.f32 %v781_v2, %v2933_v6 }
 0x288   :  { %v1318_v2 = vpop.f32.mrf.mxu1 }
 0x289   :  { %v941_v16 = vadd.f32 %v3021_v44, %v807_v38 }
 0x28a   :  { %v1163_v48 = vpop.f32.mrf.mxu3 }
 0x28d   :  { %v1027_v20 = vpop.f32.mrf.mxu2 }
 0x28e   :  { %v3080_v35 = vpop.f32.mrf.mxu0  ;;  %v1067_v46 = vadd.f32 %v1027_v20, %v2979_v4  ;;  %v803_v4 = vadd.f32 %v3001_v11, %v2901_v13  ;;  %v808_v11 = vadd.f32 %v3037_v37, %v2939_v3 }
 0x28f   :  { %3353 = vst [vmem:[#allocation12_spill] sm:$0xff] %v3080_v35  ;;  %v1199_v35 = vadd.f32 %v1157_v23, %v1066_v22 }
 0x290   :  { %v1200_v31 = vadd.f32 %v1160_v27, %v1067_v46 }
 0x291   :  { %v1333_v30 = vadd.f32 %v1291_v58, %v1199_v35 }
 0x292   :  { %v1166_v9 = vpop.f32.mrf.mxu3 }
 0x293   :  { %v3100_v6 = vadd.f32 %v3052_v19, %v1333_v30  ;;  %v804_v19 = vadd.f32 %v3009_v12, %v2907_v14  ;;  %v809_v14 = vadd.f32 %v3044_v29, %v2946_v17 }
 0x295   :  { %v1030_v62 = vpop.f32.mrf.mxu2  ;;  %v938_v12 = vadd.f32 %v2997_v10, %v804_v19  ;;  %v943_v35 = vadd.f32 %v3033_v47, %v809_v14 }
 0x296   :  { %v1446_v40 = vpop.f32.mrf.mxu0  ;;  %v1068_v45 = vadd.f32 %v1030_v62, %v2986_v28  ;;  %v937_v28 = vadd.f32 %v2988_v53, %v803_v4  ;;  %v1523_v62 = vrot.slane %v3100_v6, 1  ;;  %v942_v53 = vadd.f32 %v3027_v1, %v808_v11 }
 0x29a   :  { %v1169_v36 = vpop.f32.mrf.mxu3 }
 0x29d   :  { %v1033_v54 = vpop.f32.mrf.mxu2 }
 0x29e   :  { %v1449_v7 = vpop.f32.mrf.mxu0 }
 0x2a2   :  { %v3072_v60 = vpop.f32.mrf.mxu3 }
 0x2a5   :  { %v1036_v25 = vpop.f32.mrf.mxu2 }
 0x2a6   :  { %v1452_v20 = vpop.f32.mrf.mxu0 }
 0x2aa   :  { %v3076_v5 = vpop.f32.mrf.mxu3 }
 0x2ab   :  { %3351 = vst [vmem:[#allocation10_spill] sm:$0xff] %v3076_v5 }
 0x2ad   :  { %v1039_v34 = vpop.f32.mrf.mxu2 }
 0x2ae   :  { %v1455_v17 = vpop.f32.mrf.mxu0 }
 0x2b2   :  { %v1178_v61 = vpop.f32.mrf.mxu3 }
 0x2b5   :  { %v3082_v49 = vpop.f32.mrf.mxu2 }
 0x2b6   :  { %3354 = vst [vmem:[#allocation14_spill] sm:$0xff] %v3082_v49  ;;  %v1334_v49 = vadd.f32 %v1294_v56, %v1200_v31  ;;  %v1070_v56 = vadd.f32 %v1036_v25, %v937_v28  ;;  %v3360_v28 = vld [vmem:[#allocation7_spill] sm:$0xff]  ;;  %v1458_v11 = vpop.f32.mrf.mxu0 }
 0x2b8   :  { %v3095_v27 = vadd.f32 %v1428_v0, %v1334_v49 }
 0x2ba   :  { %v1181_v50 = vpop.f32.mrf.mxu3  ;;  %v1524_v0 = vrot.slane %v3095_v27, 1 }
 0x2bd   :  { %v1045_v55 = vpop.f32.mrf.mxu2  ;;  %v3356_v49 = vld [vmem:[#allocation14_spill] sm:$0xff] }
 0x2be   :  { %v1073_v18 = vadd.f32 %v1045_v55, %v940_v42  ;;  %v1201_v55 = vadd.f32 %v1163_v48, %v1068_v45  ;;  %v1069_v45 = vadd.f32 %v1033_v54, %v2995_v15 }
 0x2c0   :  { %v1206_v5 = vadd.f32 %v1178_v61, %v1073_v18  ;;  %v1335_v58 = vadd.f32 %v1297_v26, %v1201_v55  ;;  %v1202_v37 = vadd.f32 %v1166_v9, %v1069_v45  ;;  %v1525_v26 = vsel %vm469_vm4, %v1523_v62, %v1524_v0 }
 0x2c1   :  { %v805_v18 = vadd.f32 %v3017_v8, %v2913_v57  ;;  %v3355_v57 = vld [vmem:[#allocation5_spill] sm:$0xff] }
 0x2c2   :  { %v1340_v43 = vadd.f32 %v1312_v21, %v1206_v5  ;;  %v1184_v13 = vpop.f32.mrf.mxu3  ;;  %v3114_v3 = vadd.f32 %v3060_v33, %v1335_v58  ;;  %v1321_v5 = vpop.f32.mrf.mxu1 }
 0x2c3   :  { %v939_v8 = vadd.f32 %v3355_v57, %v805_v18  ;;  %v3193_v57 = vld [vmem:[%s3320_s4] ss:$0 sm:$0xff]  ;;  %s1801_s4 = sshll.u32 %s3326_s10, 4  ;;  %s1802_s4 = int_to_ptr.hbm [resolvable:$true] %s1801_s4 }
 0x2c4   :  { %v3093_v41 = vadd.f32 %v1446_v40, %v1340_v43  ;;  %v3358_v43 = vld [vmem:[#allocation10_spill] sm:$0xff] }
 0x2c5   :  { %v1048_v23 = vpop.f32.mrf.mxu2 }
 0x2c6   :  { %v1074_v51 = vadd.f32 %v1048_v23, %v941_v16  ;;  %1488 = vrot.lane.b32.xlu0 %v3093_v41, %s2018_s3  ;;  %v3359_v23 = vld [vmem:[#allocation11_spill] sm:$0xff] }
 0x2c8   :  { %v1207_v44 = vadd.f32 %v1181_v50, %v1074_v51  ;;  %v1203_v50 = vadd.f32 %v1169_v36, %v1070_v56  ;;  %v1526_v36 = vrot.slane %v3114_v3, 1 }
 0x2ca   :  { %v1341_v48 = vadd.f32 %v1315_v52, %v1207_v44  ;;  %v1336_v52 = vadd.f32 %v3062_v63, %v1202_v37  ;;  %v1337_v33 = vadd.f32 %v3066_v32, %v1203_v50  ;;  %v1187_v9 = vpop.f32.mrf.mxu3  ;;  %v1527_v32 = vsel %vm469_vm4, %v1524_v0, %v1526_v36  ;;  %v1324_v31 = vpop.f32.mrf.mxu1 }
 0x2cc   :  { %v3111_v38 = vadd.f32 %v1449_v7, %v1341_v48  ;;  %v1071_v7 = vadd.f32 %v1039_v34, %v938_v12  ;;  %v3132_v10 = vadd.f32 %v3064_v39, %v1336_v52  ;;  %v3135_v29 = vadd.f32 %v3068_v24, %v1337_v33  ;;  %v3362_v48 = vld [vmem:[#allocation12_spill] sm:$0xff] }
 0x2cd   :  { %v1051_v15 = vpop.f32.mrf.mxu2  ;;  %v1072_v39 = vadd.f32 %v3356_v49, %v939_v8 }
 0x2ce   :  { %v1075_v54 = vadd.f32 %v1051_v15, %v942_v53  ;;  %1490 = vrot.lane.b32.xlu1 %v3111_v38, %s2018_s3  ;;  %1536 = vrot.lane.b32.xlu0 %v1525_v26, %s2018_s3  ;;  %v1204_v34 = vadd.f32 %v3072_v60, %v1071_v7  ;;  %v1528_v40 = vrot.slane %v3132_v10, 1  ;;  %v1530_v24 = vrot.slane %v3135_v29, 1  ;;  %v3363_v53 = vld [vmem:[#allocation6_spill] sm:$0xff] }
 0x2cf   :  { %v1205_v4 = vadd.f32 %v3358_v43, %v1072_v39 }
 0x2d0   :  { %v1208_v1 = vadd.f32 %v1184_v13, %v1075_v54  ;;  %v1338_v46 = vadd.f32 %v3357_v59, %v1204_v34  ;;  %v1529_v16 = vsel %vm469_vm4, %v1526_v36, %v1528_v40  ;;  %v1531_v55 = vsel %vm469_vm4, %v1528_v40, %v1530_v24  ;;  %v1461_v54 = vpop.f32.mrf.mxu0 }
 0x2d2   :  { %v1342_v25 = vadd.f32 %v1318_v2, %v1208_v1  ;;  %v1190_v42 = vpop.f32.mrf.mxu3  ;;  %v3153_v51 = vadd.f32 %v3359_v23, %v1338_v46  ;;  %v3361_v2 = vld [vmem:[#allocation13_spill] sm:$0xff]  ;;  %v1327_v15 = vpop.f32.mrf.mxu1 }
 0x2d3   :  { %v1339_v58 = vadd.f32 %v3361_v2, %v1205_v4 }
 0x2d4   :  { %v3129_v61 = vadd.f32 %v1452_v20, %v1342_v25  ;;  %v1532_v56 = vrot.slane %v3153_v51, 1 }
 0x2d5   :  { %v1054_v63 = vpop.f32.mrf.mxu2  ;;  %v3165_v20 = vadd.f32 %v3362_v48, %v1339_v58 }
 0x2d6   :  { %v1076_v21 = vadd.f32 %v1054_v63, %v943_v35  ;;  %1492 = vrot.lane.b32.xlu2 %v3129_v61, %s2018_s3  ;;  %1538 = vrot.lane.b32.xlu1 %v1527_v32, %s2018_s3  ;;  %v1533_v50 = vsel %vm469_vm4, %v1530_v24, %v1532_v56  ;;  %v1603_v63 = vld [vmem:[%s3321_s5] sm:$0x3f] }
 0x2d7   :  { %v1534_v14 = vrot.slane %v3165_v20, 1  ;;  %1966 = vmatpush.msk.msrb.mxu2 %vm681_vm8, %v1603_v63 }
 0x2d8   :  { %v1209_v47 = vadd.f32 %v1187_v9, %v1076_v21  ;;  %v3364_v9 = vld [vmem:[#allocation9_spill] sm:$0xff]  ;;  %v1464_v35 = vpop.f32.mrf.mxu0 }
 0x2d9   :  { %v1535_v33 = vsel %vm469_vm4, %v1532_v56, %v1534_v14 }
 0x2da   :  { %v1343_v22 = vadd.f32 %v1321_v5, %v1209_v47  ;;  %v1193_v62 = vpop.f32.mrf.mxu3  ;;  %v1330_v5 = vpop.f32.mrf.mxu1 }
 0x2dc   :  { %v3147_v60 = vadd.f32 %v1455_v17, %v1343_v22 }
 0x2dd   :  { %v1057_v30 = vpop.f32.mrf.mxu2 }
 0x2de   :  { %v1077_v13 = vadd.f32 %v1057_v30, %v3360_v28  ;;  %1540 = vrot.lane.b32.xlu2 %v1529_v16, %s2018_s3  ;;  %1542 = vrot.lane.b32.xlu1 %v1531_v55, %s2018_s3 }
 0x2df   :  { %1494 = vrot.lane.b32.xlu0 %v3147_v60, %s2018_s3 }
 0x2e0   :  { %v1210_v44 = vadd.f32 %v1190_v42, %v1077_v13 }
 0x2e2   :  { %v1344_v45 = vadd.f32 %v1324_v31, %v1210_v44  ;;  %v1196_v7 = vpop.f32.mrf.mxu3 }
 0x2e4   :  { %v3162_v0 = vadd.f32 %v1458_v11, %v1344_v45 }
 0x2e5   :  { %v1060_v19 = vpop.f32.mrf.mxu2 }
 0x2e6   :  { %v1078_v37 = vadd.f32 %v1060_v19, %v3363_v53  ;;  %1496 = vrot.lane.b32.xlu2 %v3162_v0, %s2018_s3 }
 0x2e7   :  { %1544 = vrot.lane.b32.xlu0 %v1533_v50, %s2018_s3 }
 0x2e8   :  { %v1211_v26 = vadd.f32 %v1193_v62, %v1078_v37  ;;  %v1696_v62 = vld [vmem:[%s3323_s7 + $0x78] sm:$0x3f]  ;;  %v1694_v37 = vld [vmem:[%s3323_s7 + $0x68] sm:$0xff] }
 0x2e9   :  { %1974 = vmatpush.msk.msrb.mxu3 %vm681_vm8, %v1696_v62 }
 0x2ea   :  { %v1345_v12 = vadd.f32 %v1327_v15, %v1211_v26  ;;  %v1693_v15 = vld [vmem:[%s3323_s7 + $0x60] sm:$0xff] }
 0x2ec   :  { %v3173_v1 = vadd.f32 %v1461_v54, %v1345_v12 }
 0x2ed   :  { %v1063_v52 = vpop.f32.mrf.mxu2 }
 0x2ee   :  { %v1079_v36 = vadd.f32 %v1063_v52, %v3364_v9  ;;  %1546 = vrot.lane.b32.xlu2 %v1535_v33, %s2018_s3  ;;  %1498 = vrot.lane.b32.xlu1 %v3173_v1, %s2018_s3 }
 0x2f0   :  { %v1212_v25 = vadd.f32 %v1196_v7, %v1079_v36  ;;  %v1690_v36 = vld [vmem:[%s3323_s7 + $0x48] sm:$0xff] }
 0x2f2   :  { %v1346_v18 = vadd.f32 %v1330_v5, %v1212_v25  ;;  %v1689_v5 = vld [vmem:[%s3323_s7 + $0x40] sm:$0xff] }
 0x2f4   :  { %v3180_v17 = vadd.f32 %v1464_v35, %v1346_v18 }
 0x2f6   :  { %1548 = vrot.lane.b32.xlu1 %v1534_v14, %s2018_s3  ;;  %1500 = vrot.lane.b32.xlu0 %v3180_v17, %s2018_s3 }
 0x330   :  { %v1493_v21 = vpop.permute.xlu2 %1492 }
 0x338   :  { %v1489_v32 = vpop.permute.xlu0 %1488  ;;  %v1541_v42 = vpop.permute.xlu2 %1540 }
 0x339   :  { %v1509_v34 = vadd.f32 %v1489_v32, %v3100_v6 }
 0x33b   :  { %v1568_v49 = vadd.f32 %v3193_v57, %v1509_v34 }
 0x33d   :  { %v1575_v59 = vmax.f32 %v1568_v49, 0.0  ;;  %v1686_v49 = vld [vmem:[%s3323_s7 + $0x28] sm:$0xff] }
 0x340   :  { %v1491_v8 = vpop.permute.xlu1 %1490  ;;  %v1537_v47 = vpop.permute.xlu0 %1536 }
 0x341   :  { %v1557_v39 = vadd.f32 %v1537_v47, %v3093_v41  ;;  %v1510_v24 = vadd.f32 %v1491_v8, %v3095_v27  ;;  %v1559_v41 = vadd.f32 %v1541_v42, %v3129_v61  ;;  %v1511_v27 = vadd.f32 %v1493_v21, %v3114_v3  ;;  %v1497_v56 = vpop.permute.xlu2 %1496 }
 0x342   :  { %v1513_v50 = vadd.f32 %v1497_v56, %v3135_v29  ;;  %v1691_v29 = vld [vmem:[%s3323_s7 + $0x50] sm:$0xff] }
 0x343   :  { %v1582_v40 = vadd.f32 %v3193_v57, %v1557_v39  ;;  %v1569_v31 = vadd.f32 %v3193_v57, %v1510_v24  ;;  %v1584_v23 = vadd.f32 %v3193_v57, %v1559_v41  ;;  %v1570_v11 = vadd.f32 %v3193_v57, %v1511_v27  ;;  %v1673_v56 = vld [vmem:[%s3322_s6 + $0x30] sm:$0x1] }
 0x344   :  { %v1572_v12 = vadd.f32 %v3193_v57, %v1513_v50 }
 0x345   :  { %v1589_v46 = vmax.f32 %v1582_v40, 0.0  ;;  %v1576_v30 = vmax.f32 %v1569_v31, 0.0  ;;  %v1577_v58 = vmax.f32 %v1570_v11, 0.0  ;;  %v1685_v40 = vld [vmem:[%s3323_s7 + $0x20] sm:$0xff] }
 0x346   :  { %v1579_v7 = vmax.f32 %v1572_v12, 0.0  ;;  %v1681_v31 = vld [vmem:[%s3323_s7] sm:$0xff] }
 0x347   :  { %v1596_v6 = vmax.f32 %v1575_v59, %v1589_v46 }
 0x348   :  { %v1539_v22 = vpop.permute.xlu1 %1538 }
 0x349   :  { %v1558_v43 = vadd.f32 %v1539_v22, %v3111_v38  ;;  %1967 = vmatmul.msk.f32.vlgmr.msrb.gmra.mxu2 %vm1604_vm9, %v1596_v6  ;;  %v1591_v38 = vmax.f32 %v1584_v23, 0.0  ;;  %v1547_v52 = vpop.permute.xlu2 %1546 }
 0x34a   :  { %v1562_v25 = vadd.f32 %v1547_v52, %v3173_v1  ;;  %v1687_v1 = vld [vmem:[%s3323_s7 + $0x30] sm:$0xff] }
 0x34b   :  { %v1583_v4 = vadd.f32 %v3193_v57, %v1558_v43  ;;  %v1598_v61 = vmax.f32 %v1577_v58, %v1591_v38  ;;  %v1667_v43 = vld [vmem:[%s3322_s6] sm:$0xff] }
 0x34c   :  { %v1587_v34 = vadd.f32 %v3193_v57, %v1562_v25 }
 0x34d   :  { %v1590_v16 = vmax.f32 %v1583_v4, 0.0 }
 0x34e   :  { %v1594_v39 = vmax.f32 %v1587_v34, 0.0 }
 0x34f   :  { %v1597_v55 = vmax.f32 %v1576_v30, %v1590_v16  ;;  %v1668_v30 = vld [vmem:[%s3322_s6 + $0x8] sm:$0xff] }
 0x350   :  { %v1543_v28 = vpop.permute.xlu1 %1542 }
 0x351   :  { %v1495_v13 = vpop.permute.xlu0 %1494  ;;  %1968 = vmatmul.msk.f32.gmra.mxu2 %vm1604_vm9, %v1597_v55  ;;  %v1560_v44 = vadd.f32 %v1543_v28, %v3147_v60  ;;  %v1695_v60 = vld [vmem:[%s3323_s7 + $0x70] sm:$0xff] }
 0x352   :  { %v1512_v2 = vadd.f32 %v1495_v13, %v3132_v10  ;;  %1723 = vmatpush.msrb.mxu3 %v1695_v60  ;;  %v1669_v55 = vld [vmem:[%s3322_s6 + $0x10] sm:$0xff]  ;;  %v1670_v13 = vld [vmem:[%s3322_s6 + $0x18] sm:$0xff] }
 0x353   :  { %v1585_v45 = vadd.f32 %v3193_v57, %v1560_v44  ;;  %v1671_v44 = vld [vmem:[%s3322_s6 + $0x20] sm:$0xff] }
 0x354   :  { %v1571_v3 = vadd.f32 %v3193_v57, %v1512_v2  ;;  %1724 = vmatpush.msrb.mxu3 %v1694_v37 }
 0x355   :  { %v1592_v10 = vmax.f32 %v1585_v45, 0.0 }
 0x356   :  { %v1578_v19 = vmax.f32 %v1571_v3, 0.0  ;;  %1725 = vmatpush.msrb.mxu3 %v1693_v15 }
 0x358   :  { %v1599_v26 = vmax.f32 %v1578_v19, %v1592_v10 }
 0x359   :  { %v1545_v48 = vpop.permute.xlu0 %1544  ;;  %1969 = vmatmul.msk.f32.gmra.mxu2 %vm1604_vm9, %v1598_v61  ;;  %v1672_v61 = vld [vmem:[%s3322_s6 + $0x28] sm:$0xff] }
 0x35a   :  { %v1561_v53 = vadd.f32 %v1545_v48, %v3162_v0  ;;  %v1692_v0 = vld [vmem:[%s3323_s7 + $0x58] sm:$0xff] }
 0x35b   :  { %1726 = vmatpush.msrb.mxu3 %v1692_v0 }
 0x35c   :  { %v1586_v54 = vadd.f32 %v3193_v57, %v1561_v53 }
 0x35d   :  { %1727 = vmatpush.msrb.mxu3 %v1691_v29 }
 0x35e   :  { %v1593_v33 = vmax.f32 %v1586_v54, 0.0  ;;  %v1991_v54 = vld [vmem:[%s3325_s9] ss:$0 sm:$0xff] }
 0x35f   :  { %1728 = vmatpush.msrb.mxu3 %v1690_v36 }
 0x360   :  { %v1499_v14 = vpop.permute.xlu1 %1498  ;;  %v1600_v18 = vmax.f32 %v1579_v7, %v1593_v33 }
 0x361   :  { %1970 = vmatmul.msk.f32.gmra.mxu2 %vm1604_vm9, %v1599_v26  ;;  %v1514_v9 = vadd.f32 %v1499_v14, %v3153_v51  ;;  %v1688_v51 = vld [vmem:[%s3323_s7 + $0x38] sm:$0xff]  ;;  %1729 = vmatpush.msrb.mxu3 %v1689_v5  ;;  %v1760_v26 = vld [vmem:[%s3324_s8] sm:$0x3] }
 0x363   :  { %v1573_v35 = vadd.f32 %v3193_v57, %v1514_v9  ;;  %1730 = vmatpush.msrb.mxu3 %v1688_v51 }
 0x365   :  { %v1580_v21 = vmax.f32 %v1573_v35, 0.0  ;;  %1731 = vmatpush.msrb.mxu3 %v1687_v1 }
 0x367   :  { %1732 = vmatpush.msrb.mxu3 %v1686_v49  ;;  %v1601_v24 = vmax.f32 %v1580_v21, %v1594_v39 }
 0x368   :  { %v1549_v63 = vpop.permute.xlu1 %1548  ;;  %v1501_v32 = vpop.permute.xlu0 %1500 }
 0x369   :  { %1971 = vmatmul.msk.f32.gmra.mxu2 %vm1604_vm9, %v1600_v18  ;;  %v1563_v8 = vadd.f32 %v1549_v63, %v3180_v17  ;;  %v1515_v47 = vadd.f32 %v1501_v32, %v3165_v20  ;;  %v1684_v20 = vld [vmem:[%s3323_s7 + $0x18] sm:$0xff]  ;;  %1733 = vmatpush.msrb.mxu3 %v1685_v40  ;;  %v1683_v17 = vld [vmem:[%s3323_s7 + $0x10] sm:$0xff] }
 0x36b   :  { %v1588_v59 = vadd.f32 %v3193_v57, %v1563_v8  ;;  %v1574_v46 = vadd.f32 %v3193_v57, %v1515_v47  ;;  %1734 = vmatpush.msrb.mxu3 %v1684_v20  ;;  %v1682_v57 = vld [vmem:[%s3323_s7 + $0x8] sm:$0xff] }
 0x36d   :  { %v1595_v6 = vmax.f32 %v1588_v59, 0.0  ;;  %v1581_v22 = vmax.f32 %v1574_v46, 0.0  ;;  %1735 = vmatpush.msrb.mxu3 %v1683_v17 }
 0x36f   :  { %v1602_v42 = vmax.f32 %v1581_v22, %v1595_v6  ;;  %1736 = vmatpush.msrb.mxu3 %v1682_v57 }
 0x371   :  { %1972 = vmatmul.msk.f32.gmra.mxu2 %vm1604_vm9, %v1601_v24  ;;  %1737 = vmatpush.msrb.mxu3 %v1681_v31 }
 0x379   :  { %1973 = vmatmul.msk.f32.gmra.mxu2 %vm1604_vm9, %v1602_v42 }
 0x3cc   :  { %v1646_v4 = vpop.f32.mrf.mxu2 }
 0x3cd   :  { %v1674_v41 = vmul.f32 %v1667_v43, %v1646_v4 }
 0x3cf   :  { %1975 = vmatmul.msk.f32.vlgmr.msrb.gmra.mxu3 %vm1697_vm10, %v1674_v41 }
 0x3d4   :  { %v1649_v16 = vpop.f32.mrf.mxu2 }
 0x3d5   :  { %v1675_v27 = vmul.f32 %v1668_v30, %v1649_v16 }
 0x3d7   :  { %1976 = vmatmul.msk.f32.gmra.mxu3 %vm1697_vm10, %v1675_v27 }
 0x3dc   :  { %v1652_v23 = vpop.f32.mrf.mxu2 }
 0x3dd   :  { %v1676_v28 = vmul.f32 %v1669_v55, %v1652_v23 }
 0x3df   :  { %1977 = vmatmul.msk.f32.gmra.mxu3 %vm1697_vm10, %v1676_v28 }
 0x3e4   :  { %v1655_v11 = vpop.f32.mrf.mxu2 }
 0x3e5   :  { %v1677_v38 = vmul.f32 %v1670_v13, %v1655_v11 }
 0x3e7   :  { %1978 = vmatmul.msk.f32.gmra.mxu3 %vm1697_vm10, %v1677_v38 }
 0x3ec   :  { %v1658_v2 = vpop.f32.mrf.mxu2 }
 0x3ed   :  { %v1678_v58 = vmul.f32 %v1671_v44, %v1658_v2 }
 0x3ef   :  { %1979 = vmatmul.msk.f32.gmra.mxu3 %vm1697_vm10, %v1678_v58 }
 0x3f4   :  { %v1661_v45 = vpop.f32.mrf.mxu2 }
 0x3f5   :  { %v1679_v3 = vmul.f32 %v1672_v61, %v1661_v45 }
 0x3f7   :  { %1980 = vmatmul.msk.f32.gmra.mxu3 %vm1697_vm10, %v1679_v3 }
 0x3fc   :  { %v1664_v48 = vpop.f32.mrf.mxu2 }
 0x3fd   :  { %v1680_v62 = vmul.f32 %v1673_v56, %v1664_v48 }
 0x3ff   :  { %1981 = vmatmul.msk.f32.gmra.mxu3 %vm1697_vm10, %v1680_v62 }
 0x452   :  { %v1739_v60 = vpop.f32.mrf.mxu3 }
 0x45a   :  { %v1742_v10 = vpop.f32.mrf.mxu3 }
 0x462   :  { %v1745_v19 = vpop.f32.mrf.mxu3 }
 0x46a   :  { %v1748_v53 = vpop.f32.mrf.mxu3 }
 0x472   :  { %v1751_v37 = vpop.f32.mrf.mxu3 }
 0x47a   :  { %v1754_v50 = vpop.f32.mrf.mxu3 }
 0x482   :  { %v1757_v15 = vpop.f32.mrf.mxu3 }
 0x483   :  { %1982 = vmatpush.msk.msra.mxu1 %vm1349_vm5, %v1757_v15 }
 0x485   :  { %1782 = vmatpush.msra.mxu1 %v1754_v50 }
 0x487   :  { %1783 = vmatpush.msra.mxu1 %v1751_v37 }
 0x489   :  { %1784 = vmatpush.msra.mxu1 %v1748_v53 }
 0x48b   :  { %1785 = vmatpush.msra.mxu1 %v1745_v19 }
 0x48d   :  { %1786 = vmatpush.msra.mxu1 %v1742_v10 }
 0x48f   :  { %1787 = vmatpush.msra.mxu1 %v1739_v60 }
 0x490   :  { %1983 = vmatmul.msk.f32.vlgmr.msra.gmra.mxu1 %vm1765_vm11, %v1760_v26 }
 0x50d   :  { %v1789_v14 = vpop.f32.mrf.mxu1 }
 0x50e   :  { %v1790_v0 = vadd.f32 %v1991_v54, %v1789_v14 }
 0x510   :  { %1793 = vst.msk [vmem:[#allocation2] sm:$0x3] %vm1792_vm12, %v1790_v0 }
 0x511   :  { %1804 = dma.vmem_to_hbm [thread:$0]  %s1800_s22, 32, %s1802_s4, [#allocation3]  }
 0x512   :  { %2016 = dma.done.wait [#allocation3], 32  }
 0x513   :  { %2017 = vsyncadd [#allocation3], 4294967264 }
 0x514   :  { %1809 = vsyncpa [#allocation3], 1 }

</bundles_post_ra>
